<compile_context>
chip_gen: v7x
topology: tpu7x:2x2x1
jax: 0.10.0
libtpu: 0.0.40
codegen_flags: <defaults>
</compile_context>

<pallas_src>
import numpy as np
import jax
import jax.numpy as jnp
from jax.experimental import pallas as pl
from jax.experimental.pallas import tpu as pltpu

BN_EPS = 1e-5
LANE = 128


# ------------------------------ kernel factory -------------------------------

def _make_encoder_kernel(meta):
    """meta: per-layer static dicts {kk, cout, m, cnt}.
    Kernel refs: (xg, w_1, bn_1, msk_1, ..., w_L, bn_L, msk_L, out)."""
    n_layers = len(meta)

    def kernel(*refs):
        xg_ref = refs[0]
        out_ref = refs[-1]
        act = None                                    # bf16 (C_{l-1}, M_{l-1}) value, l >= 1
        for l, lm in enumerate(meta):
            w_ref, bn_ref, msk_ref = refs[1 + 3 * l: 4 + 3 * l]
            kk, cout, m = lm['kk'], lm['cout'], lm['m']

            # Conv = sum over taps of (Cout,Cin)@(Cin,M) bf16 MXU matmuls, f32 acc.
            # Tap t of this layer is the aligned lane slice [t*m, (t+1)*m) of the
            # previous activation (composed-patch layout), so no im2col in-kernel.
            acc = jnp.zeros((cout, m), jnp.float32)
            for t in range(kk):
                if l == 0:
                    chunk = xg_ref[:, t * m:(t + 1) * m]          # bf16, aligned slice
                else:
                    chunk = act[:, t * m:(t + 1) * m]
                acc = acc + jnp.dot(w_ref[t], chunk,
                                    preferred_element_type=jnp.float32)

            # Train-mode BatchNorm folded into one per-channel scale/shift.
            # rep picks each true (n,h,w) exactly once -> stats match PyTorch exactly.
            valid = msk_ref[0:1, :]                               # (1, m) in {0,1}
            rep = msk_ref[1:2, :]                                 # (1, m) in {0,1}
            inv_cnt = 1.0 / lm['cnt']
            mean = jnp.sum(acc * rep, axis=1, keepdims=True) * inv_cnt        # XLU reduce
            diff = acc - mean
            var = jnp.sum(diff * diff * rep, axis=1, keepdims=True) * inv_cnt  # centered
            scale = bn_ref[:, 0:1] * jax.lax.rsqrt(var + BN_EPS)              # EUP
            shift = bn_ref[:, 1:2] - mean * scale
            y = jnp.maximum(acc * scale + shift, 0.0) * valid     # ReLU; zero padding cols

            if l == n_layers - 1:
                out_ref[...] = y                                  # (C_L, M_L) f32, 128-lane store
            else:
                act = y.astype(jnp.bfloat16)                      # stays in VMEM, never hits HBM

    return kernel


# ------------------------- build-time position planning -----------------------

def _plan_positions(N, H0, W0, conv_params):
    """Composed position lists, last layer -> input. Each entry: (n, h, w, valid)."""
    dims = [(H0, W0)]
    for _, s, k, p in conv_params:
        H, W = dims[-1]
        dims.append(((H + 2 * p - k) // s + 1, (W + 2 * p - k) // s + 1))
    L = len(conv_params)

    def pad128(pos):
        while len(pos) % LANE:
            pos.append((0, 0, 0, False))
        return pos

    plans = [None] * (L + 1)
    HL, WL = dims[L]
    pos_L = [(n, h, w, True) for n in range(N) for h in range(HL) for w in range(WL)]
    plans[L] = dict(pos=pad128(list(pos_L)), cnt=N * HL * WL, hw=dims[L])

    for l in range(L, 0, -1):
        _, s, k, p = conv_params[l - 1]
        Hin, Win = dims[l - 1]
        prev = []
        for dy in range(k):                       # tap-major blocks, t = dy*k + dx
            for dx in range(k):
                for (n, h, w, v) in plans[l]['pos']:
                    hh, ww = h * s + dy - p, w * s + dx - p
                    ok = v and (0 <= hh < Hin) and (0 <= ww < Win)
                    prev.append((n, hh, ww, True) if ok else (0, 0, 0, False))
        if l - 1 >= 1:
            # ensure every true position of layer l-1 appears -> exact batch stats
            seen = {(n, h, w) for (n, h, w, v) in prev if v}
            for n in range(N):
                for h in range(Hin):
                    for w in range(Win):
                        if (n, h, w) not in seen:
                            prev.append((n, h, w, True))
        plans[l - 1] = dict(pos=pad128(prev), cnt=N * Hin * Win, hw=dims[l - 1])
    return plans


def _masks_from_pos(pos):
    valid = np.zeros((len(pos),), np.float32)
    rep = np.zeros((len(pos),), np.float32)
    seen = set()
    for j, (n, h, w, v) in enumerate(pos):
        if v:
            valid[j] = 1.0
            if (n, h, w) not in seen:
                seen.add((n, h, w))
                rep[j] = 1.0
    return np.stack([valid, rep], axis=0)          # (2, M) f32


# ----------------------------- parameter building -----------------------------

def build_feature_encoder(key, in_channels, config):
    """Mirror FeatureEncoder.__init__: one (Conv2d + BatchNorm2d) Block per entry.
    Conv bias is not materialized (exactly cancelled by train-mode BN)."""
    layers = []
    cin = in_channels
    for f, s, k, p in zip(config['no_filters'], config['stride'],
                          config['filter_size'], config['padding']):
        key, k1, k2, k3 = jax.random.split(key, 4)
        w = 0.1 * jax.random.normal(k1, (f, cin, k, k), jnp.float32)
        gamma = 1.0 + 0.1 * jax.random.normal(k2, (f,), jnp.float32)
        beta = 0.1 * jax.random.normal(k3, (f,), jnp.float32)
        layers.append(dict(w=w, gamma=gamma, beta=beta, k=int(k), s=int(s),
                           p=int(p), cin=int(cin), cout=int(f)))
        cin = f
    return layers


def plan_encoder(layers, in_channels, N, H0, W0):
    """Pre-pack operands, masks, and the single fused pallas_call for a given input shape."""
    conv_params = [(L['cout'], L['s'], L['k'], L['p']) for L in layers]
    plans = _plan_positions(N, H0, W0, conv_params)
    Lnum = len(layers)

    meta, flat_args, in_specs = [], [], None
    per_layer_specs = []
    for l, layer in enumerate(layers, start=1):
        k, cout, cin = layer['k'], layer['cout'], layer['cin']
        kk, m = k * k, len(plans[l]['pos'])
        w_np = np.asarray(layer['w'])                                  # (cout, cin, k, k)
        w_packed = jnp.asarray(np.transpose(w_np, (2, 3, 0, 1)).reshape(kk, cout, cin),
                               dtype=jnp.bfloat16)                     # (kk, cout, cin)
        bn = jnp.stack([layer['gamma'], layer['beta']], axis=1)        # (cout, 2) f32 (merged)
        msk = jnp.asarray(_masks_from_pos(plans[l]['pos']))            # (2, m)  f32 (merged)
        meta.append(dict(kk=kk, cout=cout, cin=cin, m=m, cnt=float(plans[l]['cnt'])))
        flat_args += [w_packed, bn, msk]
        per_layer_specs += [
            pl.BlockSpec((kk, cout, cin), lambda i: (0, 0, 0)),
            pl.BlockSpec((cout, 2), lambda i: (0, 0)),
            pl.BlockSpec((2, m), lambda i: (0, 0)),
        ]

    # Input gather plan: one fused XLA gather -> bf16 composed-patch slab (C0, M0).
    pos0 = plans[0]['pos']
    idx0 = np.array([n * H0 * W0 + h * W0 + w for (n, h, w, v) in pos0], np.int32)
    val0 = np.array([1.0 if v else 0.0 for (n, h, w, v) in pos0], np.float32)
    m0 = len(pos0)

    c_last, m_last = layers[-1]['cout'], meta[-1]['m']
    in_specs = [pl.BlockSpec((in_channels, m0), lambda i: (0, 0))] + per_layer_specs

    flops = int(sum(2 * lm['kk'] * lm['cout'] * lm['cin'] * lm['m'] for lm in meta))
    bytes_accessed = int(in_channels * m0 * 2
                         + sum(int(a.size) * a.dtype.itemsize for a in flat_args)
                         + c_last * m_last * 4)

    call = pl.pallas_call(
        _make_encoder_kernel(meta),
        out_shape=jax.ShapeDtypeStruct((c_last, m_last), jnp.float32),
        grid=(1,),
        in_specs=in_specs,
        out_specs=pl.BlockSpec((c_last, m_last), lambda i: (0, 0)),
        compiler_params=pltpu.CompilerParams(dimension_semantics=("arbitrary",)),
        cost_estimate=pl.CostEstimate(flops=flops,
                                      transcendentals=int(sum(lm['cout'] for lm in meta)),
                                      bytes_accessed=bytes_accessed),
    )

    HL, WL = plans[Lnum]['hw']
    return dict(call=call, flat_args=flat_args, idx0=jnp.asarray(idx0),
                val0=jnp.asarray(val0), N=N, H0=H0, W0=W0, C0=in_channels,
                CL=c_last, HL=HL, WL=WL, m_true=N * HL * WL)


# ---------------------------------- forward -----------------------------------

def feature_encoder_forward(x_nchw, enc):
    """x: (N, C, H, W) -> (N, C_L, H_L, W_L), same map as the nn.Module forward."""
    C0, N, H0, W0 = enc['C0'], enc['N'], enc['H0'], enc['W0']
    x2d = jnp.transpose(x_nchw, (1, 0, 2, 3)).reshape(C0, N * H0 * W0).astype(jnp.float32)
    # single fused gather builds the composed-patch layout directly in bf16
    xg = (jnp.take(x2d, enc['idx0'], axis=1) * enc['val0']).astype(jnp.bfloat16)
    out2d = enc['call'](xg, *enc['flat_args'])                  # ONE kernel launch
    y = out2d[:, :enc['m_true']].reshape(enc['CL'], N, enc['HL'], enc['WL'])
    return jnp.transpose(y, (1, 0, 2, 3))


def feature_encoder_reference(x_nchw, layers):
    """Pure-JAX reference with the same dtype policy (bf16 conv operands, f32 math)."""
    y = x_nchw.astype(jnp.float32)
    for layer in layers:
        w = layer['w'].astype(jnp.bfloat16).astype(jnp.float32)
        z = jax.lax.conv_general_dilated(
            y.astype(jnp.bfloat16).astype(jnp.float32), w,
            window_strides=(layer['s'], layer['s']),
            padding=[(layer['p'], layer['p'])] * 2,
            dimension_numbers=('NCHW', 'OIHW', 'NCHW'))
        mean = jnp.mean(z, axis=(0, 2, 3), keepdims=True)
        var = jnp.mean((z - mean) ** 2, axis=(0, 2, 3), keepdims=True)
        g = layer['gamma'].reshape(1, -1, 1, 1)
        b = layer['beta'].reshape(1, -1, 1, 1)
        y = jnp.maximum(g * (z - mean) * jax.lax.rsqrt(var + BN_EPS) + b, 0.0)
    return y


# ------------------------------------ main -------------------------------------

if __name__ == "__main__":
    in_channels = 4
    config = {
        'no_filters': [8, 16],
        'stride': [1, 2],
        'filter_size': [3, 3],
        'padding': [1, 1],
    }
    N, H, W = 2, 16, 16

    key = jax.random.PRNGKey(0)
    key, pkey, xkey = jax.random.split(key, 3)

    layers = build_feature_encoder(pkey, in_channels, config)
    enc = plan_encoder(layers, in_channels, N, H, W)
    x = jax.random.normal(xkey, (N, in_channels, H, W), jnp.float32)

    fwd = jax.jit(lambda inp: feature_encoder_forward(inp, enc))
    out = jax.block_until_ready(fwd(x))

    # Block1: 4->8 ch stride 1 (16x16); Block2: 8->16 ch stride 2 (8x8).
    assert out.shape == (N, config['no_filters'][-1], 8, 8), out.shape
    assert bool(jnp.all(jnp.isfinite(out)))
    ref = feature_encoder_reference(x, layers)
    assert bool(jnp.allclose(out, ref, atol=1e-2, rtol=1e-2)), \
        float(jnp.max(jnp.abs(out - ref)))
    print("KERNEL_OK")
</pallas_src>

<mosaic_0001>
module attributes {stable_mosaic.version = 11 : i64} {
  func.func @kernel(%arg0: i32, %arg1: memref<4x10368xbf16, #tpu.memory_space<vmem>>, %arg2: memref<9x8x4xbf16, #tpu.memory_space<vmem>>, %arg3: memref<8x2xf32, #tpu.memory_space<vmem>>, %arg4: memref<2x1152xf32, #tpu.memory_space<vmem>>, %arg5: memref<9x16x8xbf16, #tpu.memory_space<vmem>>, %arg6: memref<16x2xf32, #tpu.memory_space<vmem>>, %arg7: memref<2x128xf32, #tpu.memory_space<vmem>>, %arg8: memref<16x128xf32, #tpu.memory_space<vmem>>) attributes {dimension_semantics = [#tpu.dimension_semantics<arbitrary>], iteration_bounds = array<i64: 1>, scalar_prefetch = 0 : i64, scratch_operands = 0 : i64, tpu.core_type = #tpu.core_type<tc>, window_params = [{pipeline_mode = #tpu.pipeline_mode<synchronous>, transform_indices = @transform_0, window_bounds = array<i64: 4, 10368>}, {pipeline_mode = #tpu.pipeline_mode<synchronous>, transform_indices = @transform_1, window_bounds = array<i64: 9, 8, 4>}, {pipeline_mode = #tpu.pipeline_mode<synchronous>, transform_indices = @transform_2, window_bounds = array<i64: 8, 2>}, {pipeline_mode = #tpu.pipeline_mode<synchronous>, transform_indices = @transform_3, window_bounds = array<i64: 2, 1152>}, {pipeline_mode = #tpu.pipeline_mode<synchronous>, transform_indices = @transform_4, window_bounds = array<i64: 9, 16, 8>}, {pipeline_mode = #tpu.pipeline_mode<synchronous>, transform_indices = @transform_5, window_bounds = array<i64: 16, 2>}, {pipeline_mode = #tpu.pipeline_mode<synchronous>, transform_indices = @transform_6, window_bounds = array<i64: 2, 128>}, {pipeline_mode = #tpu.pipeline_mode<synchronous>, transform_indices = @transform_7, window_bounds = array<i64: 16, 128>}]} {
    %cst = arith.constant 0.000000e+00 : f32
    %0 = vector.broadcast %cst : f32 to vector<8x1152xf32>
    %c0 = arith.constant 0 : index
    %c0_0 = arith.constant 0 : index
    %1 = vector.load %arg1[%c0, %c0_0] : memref<4x10368xbf16, #tpu.memory_space<vmem>>, vector<4x1152xbf16>
    %c0_1 = arith.constant 0 : index
    %c0_2 = arith.constant 0 : index
    %c0_3 = arith.constant 0 : index
    %2 = vector.load %arg2[%c0_1, %c0_2, %c0_3] : memref<9x8x4xbf16, #tpu.memory_space<vmem>>, vector<1x8x4xbf16>
    %3 = vector.shape_cast %2 : vector<1x8x4xbf16> to vector<8x4xbf16>
    %cst_4 = arith.constant dense<0.000000e+00> : vector<8x1152xf32>
    %4 = tpu.matmul %3, %1, %cst_4 {dimension_numbers = #tpu.dot_dimension_numbers<[1], [0], [0], [1], [0, 0, 1, 1], [], []>} : vector<8x4xbf16>, vector<4x1152xbf16>, vector<8x1152xf32> -> vector<8x1152xf32>
    %5 = arith.addf %0, %4 : vector<8x1152xf32>
    %c0_5 = arith.constant 0 : index
    %c1152 = arith.constant 1152 : index
    %6 = vector.load %arg1[%c0_5, %c1152] : memref<4x10368xbf16, #tpu.memory_space<vmem>>, vector<4x1152xbf16>
    %c1 = arith.constant 1 : index
    %c0_6 = arith.constant 0 : index
    %c0_7 = arith.constant 0 : index
    %7 = vector.load %arg2[%c1, %c0_6, %c0_7] : memref<9x8x4xbf16, #tpu.memory_space<vmem>>, vector<1x8x4xbf16>
    %8 = vector.shape_cast %7 : vector<1x8x4xbf16> to vector<8x4xbf16>
    %cst_8 = arith.constant dense<0.000000e+00> : vector<8x1152xf32>
    %9 = tpu.matmul %8, %6, %cst_8 {dimension_numbers = #tpu.dot_dimension_numbers<[1], [0], [0], [1], [0, 0, 1, 1], [], []>} : vector<8x4xbf16>, vector<4x1152xbf16>, vector<8x1152xf32> -> vector<8x1152xf32>
    %10 = arith.addf %5, %9 : vector<8x1152xf32>
    %c0_9 = arith.constant 0 : index
    %c2304 = arith.constant 2304 : index
    %11 = vector.load %arg1[%c0_9, %c2304] : memref<4x10368xbf16, #tpu.memory_space<vmem>>, vector<4x1152xbf16>
    %c2 = arith.constant 2 : index
    %c0_10 = arith.constant 0 : index
    %c0_11 = arith.constant 0 : index
    %12 = vector.load %arg2[%c2, %c0_10, %c0_11] : memref<9x8x4xbf16, #tpu.memory_space<vmem>>, vector<1x8x4xbf16>
    %13 = vector.shape_cast %12 : vector<1x8x4xbf16> to vector<8x4xbf16>
    %cst_12 = arith.constant dense<0.000000e+00> : vector<8x1152xf32>
    %14 = tpu.matmul %13, %11, %cst_12 {dimension_numbers = #tpu.dot_dimension_numbers<[1], [0], [0], [1], [0, 0, 1, 1], [], []>} : vector<8x4xbf16>, vector<4x1152xbf16>, vector<8x1152xf32> -> vector<8x1152xf32>
    %15 = arith.addf %10, %14 : vector<8x1152xf32>
    %c0_13 = arith.constant 0 : index
    %c3456 = arith.constant 3456 : index
    %16 = vector.load %arg1[%c0_13, %c3456] : memref<4x10368xbf16, #tpu.memory_space<vmem>>, vector<4x1152xbf16>
    %c3 = arith.constant 3 : index
    %c0_14 = arith.constant 0 : index
    %c0_15 = arith.constant 0 : index
    %17 = vector.load %arg2[%c3, %c0_14, %c0_15] : memref<9x8x4xbf16, #tpu.memory_space<vmem>>, vector<1x8x4xbf16>
    %18 = vector.shape_cast %17 : vector<1x8x4xbf16> to vector<8x4xbf16>
    %cst_16 = arith.constant dense<0.000000e+00> : vector<8x1152xf32>
    %19 = tpu.matmul %18, %16, %cst_16 {dimension_numbers = #tpu.dot_dimension_numbers<[1], [0], [0], [1], [0, 0, 1, 1], [], []>} : vector<8x4xbf16>, vector<4x1152xbf16>, vector<8x1152xf32> -> vector<8x1152xf32>
    %20 = arith.addf %15, %19 : vector<8x1152xf32>
    %c0_17 = arith.constant 0 : index
    %c4608 = arith.constant 4608 : index
    %21 = vector.load %arg1[%c0_17, %c4608] : memref<4x10368xbf16, #tpu.memory_space<vmem>>, vector<4x1152xbf16>
    %c4 = arith.constant 4 : index
    %c0_18 = arith.constant 0 : index
    %c0_19 = arith.constant 0 : index
    %22 = vector.load %arg2[%c4, %c0_18, %c0_19] : memref<9x8x4xbf16, #tpu.memory_space<vmem>>, vector<1x8x4xbf16>
    %23 = vector.shape_cast %22 : vector<1x8x4xbf16> to vector<8x4xbf16>
    %cst_20 = arith.constant dense<0.000000e+00> : vector<8x1152xf32>
    %24 = tpu.matmul %23, %21, %cst_20 {dimension_numbers = #tpu.dot_dimension_numbers<[1], [0], [0], [1], [0, 0, 1, 1], [], []>} : vector<8x4xbf16>, vector<4x1152xbf16>, vector<8x1152xf32> -> vector<8x1152xf32>
    %25 = arith.addf %20, %24 : vector<8x1152xf32>
    %c0_21 = arith.constant 0 : index
    %c5760 = arith.constant 5760 : index
    %26 = vector.load %arg1[%c0_21, %c5760] : memref<4x10368xbf16, #tpu.memory_space<vmem>>, vector<4x1152xbf16>
    %c5 = arith.constant 5 : index
    %c0_22 = arith.constant 0 : index
    %c0_23 = arith.constant 0 : index
    %27 = vector.load %arg2[%c5, %c0_22, %c0_23] : memref<9x8x4xbf16, #tpu.memory_space<vmem>>, vector<1x8x4xbf16>
    %28 = vector.shape_cast %27 : vector<1x8x4xbf16> to vector<8x4xbf16>
    %cst_24 = arith.constant dense<0.000000e+00> : vector<8x1152xf32>
    %29 = tpu.matmul %28, %26, %cst_24 {dimension_numbers = #tpu.dot_dimension_numbers<[1], [0], [0], [1], [0, 0, 1, 1], [], []>} : vector<8x4xbf16>, vector<4x1152xbf16>, vector<8x1152xf32> -> vector<8x1152xf32>
    %30 = arith.addf %25, %29 : vector<8x1152xf32>
    %c0_25 = arith.constant 0 : index
    %c6912 = arith.constant 6912 : index
    %31 = vector.load %arg1[%c0_25, %c6912] : memref<4x10368xbf16, #tpu.memory_space<vmem>>, vector<4x1152xbf16>
    %c6 = arith.constant 6 : index
    %c0_26 = arith.constant 0 : index
    %c0_27 = arith.constant 0 : index
    %32 = vector.load %arg2[%c6, %c0_26, %c0_27] : memref<9x8x4xbf16, #tpu.memory_space<vmem>>, vector<1x8x4xbf16>
    %33 = vector.shape_cast %32 : vector<1x8x4xbf16> to vector<8x4xbf16>
    %cst_28 = arith.constant dense<0.000000e+00> : vector<8x1152xf32>
    %34 = tpu.matmul %33, %31, %cst_28 {dimension_numbers = #tpu.dot_dimension_numbers<[1], [0], [0], [1], [0, 0, 1, 1], [], []>} : vector<8x4xbf16>, vector<4x1152xbf16>, vector<8x1152xf32> -> vector<8x1152xf32>
    %35 = arith.addf %30, %34 : vector<8x1152xf32>
    %c0_29 = arith.constant 0 : index
    %c8064 = arith.constant 8064 : index
    %36 = vector.load %arg1[%c0_29, %c8064] : memref<4x10368xbf16, #tpu.memory_space<vmem>>, vector<4x1152xbf16>
    %c7 = arith.constant 7 : index
    %c0_30 = arith.constant 0 : index
    %c0_31 = arith.constant 0 : index
    %37 = vector.load %arg2[%c7, %c0_30, %c0_31] : memref<9x8x4xbf16, #tpu.memory_space<vmem>>, vector<1x8x4xbf16>
    %38 = vector.shape_cast %37 : vector<1x8x4xbf16> to vector<8x4xbf16>
    %cst_32 = arith.constant dense<0.000000e+00> : vector<8x1152xf32>
    %39 = tpu.matmul %38, %36, %cst_32 {dimension_numbers = #tpu.dot_dimension_numbers<[1], [0], [0], [1], [0, 0, 1, 1], [], []>} : vector<8x4xbf16>, vector<4x1152xbf16>, vector<8x1152xf32> -> vector<8x1152xf32>
    %40 = arith.addf %35, %39 : vector<8x1152xf32>
    %c0_33 = arith.constant 0 : index
    %c9216 = arith.constant 9216 : index
    %41 = vector.load %arg1[%c0_33, %c9216] : memref<4x10368xbf16, #tpu.memory_space<vmem>>, vector<4x1152xbf16>
    %c8 = arith.constant 8 : index
    %c0_34 = arith.constant 0 : index
    %c0_35 = arith.constant 0 : index
    %42 = vector.load %arg2[%c8, %c0_34, %c0_35] : memref<9x8x4xbf16, #tpu.memory_space<vmem>>, vector<1x8x4xbf16>
    %43 = vector.shape_cast %42 : vector<1x8x4xbf16> to vector<8x4xbf16>
    %cst_36 = arith.constant dense<0.000000e+00> : vector<8x1152xf32>
    %44 = tpu.matmul %43, %41, %cst_36 {dimension_numbers = #tpu.dot_dimension_numbers<[1], [0], [0], [1], [0, 0, 1, 1], [], []>} : vector<8x4xbf16>, vector<4x1152xbf16>, vector<8x1152xf32> -> vector<8x1152xf32>
    %45 = arith.addf %40, %44 : vector<8x1152xf32>
    %c0_37 = arith.constant 0 : index
    %c0_38 = arith.constant 0 : index
    %46 = vector.load %arg4[%c0_37, %c0_38] : memref<2x1152xf32, #tpu.memory_space<vmem>>, vector<1x1152xf32>
    %c1_39 = arith.constant 1 : index
    %c0_40 = arith.constant 0 : index
    %47 = vector.load %arg4[%c1_39, %c0_40] : memref<2x1152xf32, #tpu.memory_space<vmem>>, vector<1x1152xf32>
    %48 = vector.broadcast %47 : vector<1x1152xf32> to vector<8x1152xf32>
    %49 = arith.mulf %45, %48 : vector<8x1152xf32>
    %cst_41 = arith.constant dense<0.000000e+00> : vector<8xf32>
    %50 = vector.multi_reduction <add>, %49, %cst_41 [1] : vector<8x1152xf32> to vector<8xf32>
    %51 = vector.shape_cast %50 : vector<8xf32> to vector<8x1xf32>
    %cst_42 = arith.constant 0.001953125 : f32
    %52 = vector.broadcast %cst_42 : f32 to vector<8x1xf32>
    %53 = arith.mulf %51, %52 : vector<8x1xf32>
    %54 = vector.broadcast %53 : vector<8x1xf32> to vector<8x1152xf32>
    %55 = arith.subf %45, %54 : vector<8x1152xf32>
    %56 = arith.mulf %55, %55 : vector<8x1152xf32>
    %57 = vector.broadcast %47 : vector<1x1152xf32> to vector<8x1152xf32>
    %58 = arith.mulf %56, %57 : vector<8x1152xf32>
    %cst_43 = arith.constant dense<0.000000e+00> : vector<8xf32>
    %59 = vector.multi_reduction <add>, %58, %cst_43 [1] : vector<8x1152xf32> to vector<8xf32>
    %60 = vector.shape_cast %59 : vector<8xf32> to vector<8x1xf32>
    %cst_44 = arith.constant 0.001953125 : f32
    %61 = vector.broadcast %cst_44 : f32 to vector<8x1xf32>
    %62 = arith.mulf %60, %61 : vector<8x1xf32>
    %c0_45 = arith.constant 0 : index
    %c0_46 = arith.constant 0 : index
    %63 = vector.load %arg3[%c0_45, %c0_46] : memref<8x2xf32, #tpu.memory_space<vmem>>, vector<8x1xf32>
    %cst_47 = arith.constant 9.99999974E-6 : f32
    %64 = vector.broadcast %cst_47 : f32 to vector<8x1xf32>
    %65 = arith.addf %62, %64 : vector<8x1xf32>
    %66 = math.rsqrt %65 : vector<8x1xf32>
    %67 = arith.mulf %63, %66 : vector<8x1xf32>
    %c0_48 = arith.constant 0 : index
    %c1_49 = arith.constant 1 : index
    %68 = vector.load %arg3[%c0_48, %c1_49] : memref<8x2xf32, #tpu.memory_space<vmem>>, vector<8x1xf32>
    %69 = arith.mulf %53, %67 : vector<8x1xf32>
    %70 = arith.subf %68, %69 : vector<8x1xf32>
    %71 = vector.broadcast %67 : vector<8x1xf32> to vector<8x1152xf32>
    %72 = arith.mulf %45, %71 : vector<8x1152xf32>
    %73 = vector.broadcast %70 : vector<8x1xf32> to vector<8x1152xf32>
    %74 = arith.addf %72, %73 : vector<8x1152xf32>
    %cst_50 = arith.constant 0.000000e+00 : f32
    %75 = vector.broadcast %cst_50 : f32 to vector<8x1152xf32>
    %76 = arith.maximumf %74, %75 : vector<8x1152xf32>
    %77 = vector.broadcast %46 : vector<1x1152xf32> to vector<8x1152xf32>
    %78 = arith.mulf %76, %77 : vector<8x1152xf32>
    %79 = arith.truncf %78 : vector<8x1152xf32> to vector<8x1152xbf16>
    %cst_51 = arith.constant 0.000000e+00 : f32
    %80 = vector.broadcast %cst_51 : f32 to vector<16x128xf32>
    %81 = vector.extract_strided_slice %79 {offsets = [0, 0], sizes = [8, 128], strides = [1, 1]} : vector<8x1152xbf16> to vector<8x128xbf16>
    %c0_52 = arith.constant 0 : index
    %c0_53 = arith.constant 0 : index
    %c0_54 = arith.constant 0 : index
    %82 = vector.load %arg5[%c0_52, %c0_53, %c0_54] : memref<9x16x8xbf16, #tpu.memory_space<vmem>>, vector<1x16x8xbf16>
    %83 = vector.shape_cast %82 : vector<1x16x8xbf16> to vector<16x8xbf16>
    %cst_55 = arith.constant dense<0.000000e+00> : vector<16x128xf32>
    %84 = tpu.matmul %83, %81, %cst_55 {dimension_numbers = #tpu.dot_dimension_numbers<[1], [0], [0], [1], [0, 0, 1, 1], [], []>} : vector<16x8xbf16>, vector<8x128xbf16>, vector<16x128xf32> -> vector<16x128xf32>
    %85 = arith.addf %80, %84 : vector<16x128xf32>
    %86 = vector.extract_strided_slice %79 {offsets = [0, 128], sizes = [8, 128], strides = [1, 1]} : vector<8x1152xbf16> to vector<8x128xbf16>
    %c1_56 = arith.constant 1 : index
    %c0_57 = arith.constant 0 : index
    %c0_58 = arith.constant 0 : index
    %87 = vector.load %arg5[%c1_56, %c0_57, %c0_58] : memref<9x16x8xbf16, #tpu.memory_space<vmem>>, vector<1x16x8xbf16>
    %88 = vector.shape_cast %87 : vector<1x16x8xbf16> to vector<16x8xbf16>
    %cst_59 = arith.constant dense<0.000000e+00> : vector<16x128xf32>
    %89 = tpu.matmul %88, %86, %cst_59 {dimension_numbers = #tpu.dot_dimension_numbers<[1], [0], [0], [1], [0, 0, 1, 1], [], []>} : vector<16x8xbf16>, vector<8x128xbf16>, vector<16x128xf32> -> vector<16x128xf32>
    %90 = arith.addf %85, %89 : vector<16x128xf32>
    %91 = vector.extract_strided_slice %79 {offsets = [0, 256], sizes = [8, 128], strides = [1, 1]} : vector<8x1152xbf16> to vector<8x128xbf16>
    %c2_60 = arith.constant 2 : index
    %c0_61 = arith.constant 0 : index
    %c0_62 = arith.constant 0 : index
    %92 = vector.load %arg5[%c2_60, %c0_61, %c0_62] : memref<9x16x8xbf16, #tpu.memory_space<vmem>>, vector<1x16x8xbf16>
    %93 = vector.shape_cast %92 : vector<1x16x8xbf16> to vector<16x8xbf16>
    %cst_63 = arith.constant dense<0.000000e+00> : vector<16x128xf32>
    %94 = tpu.matmul %93, %91, %cst_63 {dimension_numbers = #tpu.dot_dimension_numbers<[1], [0], [0], [1], [0, 0, 1, 1], [], []>} : vector<16x8xbf16>, vector<8x128xbf16>, vector<16x128xf32> -> vector<16x128xf32>
    %95 = arith.addf %90, %94 : vector<16x128xf32>
    %96 = vector.extract_strided_slice %79 {offsets = [0, 384], sizes = [8, 128], strides = [1, 1]} : vector<8x1152xbf16> to vector<8x128xbf16>
    %c3_64 = arith.constant 3 : index
    %c0_65 = arith.constant 0 : index
    %c0_66 = arith.constant 0 : index
    %97 = vector.load %arg5[%c3_64, %c0_65, %c0_66] : memref<9x16x8xbf16, #tpu.memory_space<vmem>>, vector<1x16x8xbf16>
    %98 = vector.shape_cast %97 : vector<1x16x8xbf16> to vector<16x8xbf16>
    %cst_67 = arith.constant dense<0.000000e+00> : vector<16x128xf32>
    %99 = tpu.matmul %98, %96, %cst_67 {dimension_numbers = #tpu.dot_dimension_numbers<[1], [0], [0], [1], [0, 0, 1, 1], [], []>} : vector<16x8xbf16>, vector<8x128xbf16>, vector<16x128xf32> -> vector<16x128xf32>
    %100 = arith.addf %95, %99 : vector<16x128xf32>
    %101 = vector.extract_strided_slice %79 {offsets = [0, 512], sizes = [8, 128], strides = [1, 1]} : vector<8x1152xbf16> to vector<8x128xbf16>
    %c4_68 = arith.constant 4 : index
    %c0_69 = arith.constant 0 : index
    %c0_70 = arith.constant 0 : index
    %102 = vector.load %arg5[%c4_68, %c0_69, %c0_70] : memref<9x16x8xbf16, #tpu.memory_space<vmem>>, vector<1x16x8xbf16>
    %103 = vector.shape_cast %102 : vector<1x16x8xbf16> to vector<16x8xbf16>
    %cst_71 = arith.constant dense<0.000000e+00> : vector<16x128xf32>
    %104 = tpu.matmul %103, %101, %cst_71 {dimension_numbers = #tpu.dot_dimension_numbers<[1], [0], [0], [1], [0, 0, 1, 1], [], []>} : vector<16x8xbf16>, vector<8x128xbf16>, vector<16x128xf32> -> vector<16x128xf32>
    %105 = arith.addf %100, %104 : vector<16x128xf32>
    %106 = vector.extract_strided_slice %79 {offsets = [0, 640], sizes = [8, 128], strides = [1, 1]} : vector<8x1152xbf16> to vector<8x128xbf16>
    %c5_72 = arith.constant 5 : index
    %c0_73 = arith.constant 0 : index
    %c0_74 = arith.constant 0 : index
    %107 = vector.load %arg5[%c5_72, %c0_73, %c0_74] : memref<9x16x8xbf16, #tpu.memory_space<vmem>>, vector<1x16x8xbf16>
    %108 = vector.shape_cast %107 : vector<1x16x8xbf16> to vector<16x8xbf16>
    %cst_75 = arith.constant dense<0.000000e+00> : vector<16x128xf32>
    %109 = tpu.matmul %108, %106, %cst_75 {dimension_numbers = #tpu.dot_dimension_numbers<[1], [0], [0], [1], [0, 0, 1, 1], [], []>} : vector<16x8xbf16>, vector<8x128xbf16>, vector<16x128xf32> -> vector<16x128xf32>
    %110 = arith.addf %105, %109 : vector<16x128xf32>
    %111 = vector.extract_strided_slice %79 {offsets = [0, 768], sizes = [8, 128], strides = [1, 1]} : vector<8x1152xbf16> to vector<8x128xbf16>
    %c6_76 = arith.constant 6 : index
    %c0_77 = arith.constant 0 : index
    %c0_78 = arith.constant 0 : index
    %112 = vector.load %arg5[%c6_76, %c0_77, %c0_78] : memref<9x16x8xbf16, #tpu.memory_space<vmem>>, vector<1x16x8xbf16>
    %113 = vector.shape_cast %112 : vector<1x16x8xbf16> to vector<16x8xbf16>
    %cst_79 = arith.constant dense<0.000000e+00> : vector<16x128xf32>
    %114 = tpu.matmul %113, %111, %cst_79 {dimension_numbers = #tpu.dot_dimension_numbers<[1], [0], [0], [1], [0, 0, 1, 1], [], []>} : vector<16x8xbf16>, vector<8x128xbf16>, vector<16x128xf32> -> vector<16x128xf32>
    %115 = arith.addf %110, %114 : vector<16x128xf32>
    %116 = vector.extract_strided_slice %79 {offsets = [0, 896], sizes = [8, 128], strides = [1, 1]} : vector<8x1152xbf16> to vector<8x128xbf16>
    %c7_80 = arith.constant 7 : index
    %c0_81 = arith.constant 0 : index
    %c0_82 = arith.constant 0 : index
    %117 = vector.load %arg5[%c7_80, %c0_81, %c0_82] : memref<9x16x8xbf16, #tpu.memory_space<vmem>>, vector<1x16x8xbf16>
    %118 = vector.shape_cast %117 : vector<1x16x8xbf16> to vector<16x8xbf16>
    %cst_83 = arith.constant dense<0.000000e+00> : vector<16x128xf32>
    %119 = tpu.matmul %118, %116, %cst_83 {dimension_numbers = #tpu.dot_dimension_numbers<[1], [0], [0], [1], [0, 0, 1, 1], [], []>} : vector<16x8xbf16>, vector<8x128xbf16>, vector<16x128xf32> -> vector<16x128xf32>
    %120 = arith.addf %115, %119 : vector<16x128xf32>
    %121 = vector.extract_strided_slice %79 {offsets = [0, 1024], sizes = [8, 128], strides = [1, 1]} : vector<8x1152xbf16> to vector<8x128xbf16>
    %c8_84 = arith.constant 8 : index
    %c0_85 = arith.constant 0 : index
    %c0_86 = arith.constant 0 : index
    %122 = vector.load %arg5[%c8_84, %c0_85, %c0_86] : memref<9x16x8xbf16, #tpu.memory_space<vmem>>, vector<1x16x8xbf16>
    %123 = vector.shape_cast %122 : vector<1x16x8xbf16> to vector<16x8xbf16>
    %cst_87 = arith.constant dense<0.000000e+00> : vector<16x128xf32>
    %124 = tpu.matmul %123, %121, %cst_87 {dimension_numbers = #tpu.dot_dimension_numbers<[1], [0], [0], [1], [0, 0, 1, 1], [], []>} : vector<16x8xbf16>, vector<8x128xbf16>, vector<16x128xf32> -> vector<16x128xf32>
    %125 = arith.addf %120, %124 : vector<16x128xf32>
    %c0_88 = arith.constant 0 : index
    %c0_89 = arith.constant 0 : index
    %126 = vector.load %arg7[%c0_88, %c0_89] : memref<2x128xf32, #tpu.memory_space<vmem>>, vector<1x128xf32>
    %c1_90 = arith.constant 1 : index
    %c0_91 = arith.constant 0 : index
    %127 = vector.load %arg7[%c1_90, %c0_91] : memref<2x128xf32, #tpu.memory_space<vmem>>, vector<1x128xf32>
    %128 = vector.broadcast %127 : vector<1x128xf32> to vector<16x128xf32>
    %129 = arith.mulf %125, %128 : vector<16x128xf32>
    %cst_92 = arith.constant dense<0.000000e+00> : vector<16xf32>
    %130 = vector.multi_reduction <add>, %129, %cst_92 [1] : vector<16x128xf32> to vector<16xf32>
    %131 = vector.shape_cast %130 : vector<16xf32> to vector<16x1xf32>
    %cst_93 = arith.constant 7.812500e-03 : f32
    %132 = vector.broadcast %cst_93 : f32 to vector<16x1xf32>
    %133 = arith.mulf %131, %132 : vector<16x1xf32>
    %134 = vector.broadcast %133 : vector<16x1xf32> to vector<16x128xf32>
    %135 = arith.subf %125, %134 : vector<16x128xf32>
    %136 = arith.mulf %135, %135 : vector<16x128xf32>
    %137 = vector.broadcast %127 : vector<1x128xf32> to vector<16x128xf32>
    %138 = arith.mulf %136, %137 : vector<16x128xf32>
    %cst_94 = arith.constant dense<0.000000e+00> : vector<16xf32>
    %139 = vector.multi_reduction <add>, %138, %cst_94 [1] : vector<16x128xf32> to vector<16xf32>
    %140 = vector.shape_cast %139 : vector<16xf32> to vector<16x1xf32>
    %cst_95 = arith.constant 7.812500e-03 : f32
    %141 = vector.broadcast %cst_95 : f32 to vector<16x1xf32>
    %142 = arith.mulf %140, %141 : vector<16x1xf32>
    %c0_96 = arith.constant 0 : index
    %c0_97 = arith.constant 0 : index
    %143 = vector.load %arg6[%c0_96, %c0_97] : memref<16x2xf32, #tpu.memory_space<vmem>>, vector<16x1xf32>
    %cst_98 = arith.constant 9.99999974E-6 : f32
    %144 = vector.broadcast %cst_98 : f32 to vector<16x1xf32>
    %145 = arith.addf %142, %144 : vector<16x1xf32>
    %146 = math.rsqrt %145 : vector<16x1xf32>
    %147 = arith.mulf %143, %146 : vector<16x1xf32>
    %c0_99 = arith.constant 0 : index
    %c1_100 = arith.constant 1 : index
    %148 = vector.load %arg6[%c0_99, %c1_100] : memref<16x2xf32, #tpu.memory_space<vmem>>, vector<16x1xf32>
    %149 = arith.mulf %133, %147 : vector<16x1xf32>
    %150 = arith.subf %148, %149 : vector<16x1xf32>
    %151 = vector.broadcast %147 : vector<16x1xf32> to vector<16x128xf32>
    %152 = arith.mulf %125, %151 : vector<16x128xf32>
    %153 = vector.broadcast %150 : vector<16x1xf32> to vector<16x128xf32>
    %154 = arith.addf %152, %153 : vector<16x128xf32>
    %cst_101 = arith.constant 0.000000e+00 : f32
    %155 = vector.broadcast %cst_101 : f32 to vector<16x128xf32>
    %156 = arith.maximumf %154, %155 : vector<16x128xf32>
    %157 = vector.broadcast %126 : vector<1x128xf32> to vector<16x128xf32>
    %158 = arith.mulf %156, %157 : vector<16x128xf32>
    %c0_102 = arith.constant 0 : index
    %c0_103 = arith.constant 0 : index
    %159 = vector.load %arg8[%c0_102, %c0_103] : memref<16x128xf32, #tpu.memory_space<vmem>>, vector<16x128xf32>
    tpu.vector_store %arg8[%c0_102, %c0_103], %158 {strides = array<i32>} : memref<16x128xf32, #tpu.memory_space<vmem>>, vector<16x128xf32>,
    return
  }
  func.func @transform_0(%arg0: i32) -> (i32, i32) {
    %c0_i32 = arith.constant 0 : i32
    %c0_i32_0 = arith.constant 0 : i32
    %c0_i32_1 = arith.constant 0 : i32
    return %c0_i32, %c0_i32_0 : i32, i32
  }
  func.func @transform_1(%arg0: i32) -> (i32, i32, i32) {
    %c0_i32 = arith.constant 0 : i32
    %c0_i32_0 = arith.constant 0 : i32
    %c0_i32_1 = arith.constant 0 : i32
    %c0_i32_2 = arith.constant 0 : i32
    return %c0_i32, %c0_i32_0, %c0_i32_1 : i32, i32, i32
  }
  func.func @transform_2(%arg0: i32) -> (i32, i32) {
    %c0_i32 = arith.constant 0 : i32
    %c0_i32_0 = arith.constant 0 : i32
    %c0_i32_1 = arith.constant 0 : i32
    return %c0_i32, %c0_i32_0 : i32, i32
  }
  func.func @transform_3(%arg0: i32) -> (i32, i32) {
    %c0_i32 = arith.constant 0 : i32
    %c0_i32_0 = arith.constant 0 : i32
    %c0_i32_1 = arith.constant 0 : i32
    return %c0_i32, %c0_i32_0 : i32, i32
  }
  func.func @transform_4(%arg0: i32) -> (i32, i32, i32) {
    %c0_i32 = arith.constant 0 : i32
    %c0_i32_0 = arith.constant 0 : i32
    %c0_i32_1 = arith.constant 0 : i32
    %c0_i32_2 = arith.constant 0 : i32
    return %c0_i32, %c0_i32_0, %c0_i32_1 : i32, i32, i32
  }
  func.func @transform_5(%arg0: i32) -> (i32, i32) {
    %c0_i32 = arith.constant 0 : i32
    %c0_i32_0 = arith.constant 0 : i32
    %c0_i32_1 = arith.constant 0 : i32
    return %c0_i32, %c0_i32_0 : i32, i32
  }
  func.func @transform_6(%arg0: i32) -> (i32, i32) {
    %c0_i32 = arith.constant 0 : i32
    %c0_i32_0 = arith.constant 0 : i32
    %c0_i32_1 = arith.constant 0 : i32
    return %c0_i32, %c0_i32_0 : i32, i32
  }
  func.func @transform_7(%arg0: i32) -> (i32, i32) {
    %c0_i32 = arith.constant 0 : i32
    %c0_i32_0 = arith.constant 0 : i32
    %c0_i32_1 = arith.constant 0 : i32
    return %c0_i32, %c0_i32_0 : i32, i32
  }
}

</mosaic_0001>

<bundles_post_ra>
// kernel: _lambda_.1
= control target key start
LH: loop header
LB: loop body
LE: loop exit
PB: predicated region body
PF: predicated region fallthrough
CT: control target
= control target key end

     0   :  { %v43_v0 = vlaneseq  ;;  %v3971_v2 = vmov 1983009808   ;;  %v3972_v4 = vmov 0   ;;  %vm84_vm0 = vcmask 1041408   ;;  %s3976_s8 = smov 1   ;;  %s4697_s0 = inlined_call_operand.vmem [shape: bf16[4,10368], index: 0, kind: input, shape index: {}]   ;;  %s4698_s1 = inlined_call_operand.vmem [shape: bf16[9,8,4], index: 1, kind: input, shape index: {}]   ;;  %s4699_s3 = inlined_call_operand.vmem [shape: f32[2,1152], index: 3, kind: input, shape index: {}]   ;;  %s4700_s2 = inlined_call_operand.vmem [shape: f32[8,2], index: 2, kind: input, shape index: {}]   ;;  %s4701_s4 = inlined_call_operand.vmem [shape: bf16[9,16,8], index: 4, kind: input, shape index: {}]   ;;  %s4702_s6 = inlined_call_operand.vmem [shape: f32[2,128], index: 6, kind: input, shape index: {}]   ;;  %s4703_s5 = inlined_call_operand.vmem [shape: f32[16,2], index: 5, kind: input, shape index: {}]   ;;  %s4704_s7 = inlined_call_operand.vmem [shape: f32[16,128], index: 7, kind: output, shape index: {}]  }
   0x1   :  { %v31_v1 = vld [vmem:[%s4697_s0 + $0x12] sm:$0xff]  ;;  %v41_v3 = vunpack.c.l.s4 %v3971_v2  ;;  %144 = vmatprep.mubr.bf16.mxu0 %v3972_v4  ;;  %185 = vmatprep.mubr.bf16.mxu1 %v3972_v4  ;;  %v32_v5 = vld [vmem:[%s4697_s0 + $0x1a] sm:$0xff]  ;;  %v28_v24 = vld [vmem:[%s4697_s0 + $0x8] sm:$0xff]  ;;  %vm80_vm1 = vcmask 31744   ;;  %v3973_v30 = vmov 0.0   ;;  %vm3974_vm2 = vmmov 0  }
   0x2   :  { %v4025_v6 = vshrl.u32 %v43_v0, 7  ;;  %3935 = vset.pattern.permute.xlu1 %v3972_v4  ;;  %v39_v8 = vcombine.high %v31_v1, %v31_v1  ;;  %v56_v9 = vcombine.high %v32_v5, %v32_v5  ;;  %v27_v10 = vld [vmem:[%s4697_s0] sm:$0xff]  ;;  %v336_v29 = vcombine.high %v28_v24, %v28_v24  ;;  %v595_v42 = vld [vmem:[%s4697_s0 + $0x2c] sm:$0xff]  ;;  %v4096_v50 = vld [vmem:[%s4697_s0 + $0x36] sm:$0xff] }
   0x3   :  { %v42_v7 = vunpack.c.0.s8 %v41_v3  ;;  %v319_v12 = vcombine.high %v27_v10, %v27_v10  ;;  %v3456_v25 = vld [vmem:[%s4698_s1 + $0x4] sm:$0xf]  ;;  %v3457_v31 = vld.sshfl [vmem:[%s4697_s0 + $0x22] sm:$0x3 pattern:$0x76325410]  ;;  %v619_v48 = vcombine.high %v595_v42, %v595_v42  ;;  %v894_v54 = vcombine.high %v4096_v50, %v4096_v50 }
   0x4   :  { %v594_v34 = vld [vmem:[%s4697_s0 + $0x24] sm:$0xff]  ;;  %v110_v35 = vsel %vm84_vm0, %v3457_v31, 0  ;;  %v30_v43 = vld [vmem:[%s4698_s1] sm:$0xf]  ;;  %vm2876_vm3 = vcmask 1043456   ;;  %vm2872_vm4 = vcmask 64512  }
   0x5   :  { %v4032_v11 = vsub.s32 %v42_v7, %v4025_v6  ;;  %v602_v39 = vcombine.high %v594_v34, %v594_v34  ;;  %v3467_v55 = vld.sshfl [vmem:[%s4697_s0 + $0x10] sm:$0x3 pattern:$0x76325410]  ;;  %v4116_v58 = vld [vmem:[%s4697_s0 + $0x3e] sm:$0xff]  ;;  %v4140_v3 = vld [vmem:[%s4697_s0 + $0x48] sm:$0xff] }
   0x6   :  { %v4121_v59 = vld [vmem:[%s4698_s1 + $0x8] sm:$0xf]  ;;  %v388_v60 = vsel %vm84_vm0, %v3467_v55, 0  ;;  %v911_v0 = vcombine.high %v4116_v58, %v4116_v58 }
   0x7   :  { %v46_v13 = vrot.slane %v31_v1, %v4032_v11  ;;  %v53_v14 = vrot.slane %v39_v8, %v4032_v11  ;;  %v63_v15 = vrot.slane %v32_v5, %v4032_v11  ;;  %v70_v16 = vrot.slane %v56_v9, %v4032_v11  ;;  %v4206_v31 = vld [vmem:[%s4697_s0 + $0x62] sm:$0xff] }
   0x8   :  { %v333_v23 = vrot.slane %v319_v12, %v4032_v11  ;;  %v326_v32 = vrot.slane %v27_v10, %v4032_v11  ;;  %v350_v33 = vrot.slane %v336_v29, %v4032_v11  ;;  %v343_v40 = vrot.slane %v28_v24, %v4032_v11 }
   0x9   :  { %v54_v17 = vcombine.high %v46_v13, %v46_v13  ;;  %v55_v18 = vcombine.high %v53_v14, %v53_v14  ;;  %v86_v19 = vsel %vm84_vm0, %v46_v13, 0  ;;  %v92_v20 = vsel %vm84_vm0, %v53_v14, 0  ;;  %v4157_v13 = vld [vmem:[%s4697_s0 + $0x50] sm:$0xff]  ;;  %v4162_v14 = vld [vmem:[%s4698_s1 + $0xc] sm:$0xf] }
   0xa   :  { %v71_v21 = vcombine.high %v63_v15, %v63_v15  ;;  %v72_v22 = vcombine.high %v70_v16, %v70_v16  ;;  %v98_v26 = vsel %vm84_vm0, %v63_v15, 0  ;;  %v104_v27 = vsel %vm84_vm0, %v70_v16, 0 }
   0xb   :  { %3458 = vmatprep.subr.msk.bf16.mxu0 %vm84_vm0, %v54_v17  ;;  %3460 = vmatprep.subr.msk.bf16.mxu1 %vm84_vm0, %v55_v18  ;;  %v335_v28 = vcombine.high %v333_v23, %v333_v23  ;;  %v370_v36 = vsel %vm84_vm0, %v333_v23, 0  ;;  %v334_v37 = vcombine.high %v326_v32, %v326_v32  ;;  %v352_v38 = vcombine.high %v350_v33, %v350_v33 }
   0xc   :  { %113 = vmatpush1.bf16.msra.mxu0 %v86_v19  ;;  %154 = vmatpush1.bf16.msra.mxu1 %v92_v20  ;;  %v616_v41 = vrot.slane %v602_v39, %v4032_v11  ;;  %v364_v44 = vsel %vm84_vm0, %v326_v32, 0  ;;  %v382_v45 = vsel %vm84_vm0, %v350_v33, 0  ;;  %v351_v46 = vcombine.high %v343_v40, %v343_v40  ;;  %v3478_v19 = vld.sshfl [vmem:[%s4697_s0 + $0x34] sm:$0x3 pattern:$0x76325410] }
   0xd   :  { %3462 = vmatprep.subr.msk.bf16.mxu0 %vm84_vm0, %v71_v21  ;;  %3464 = vmatprep.subr.msk.bf16.mxu1 %vm84_vm0, %v72_v22  ;;  %v633_v49 = vrot.slane %v619_v48, %v4032_v11  ;;  %v376_v51 = vsel %vm84_vm0, %v343_v40, 0  ;;  %v609_v56 = vrot.slane %v594_v34, %v4032_v11  ;;  %v908_v57 = vrot.slane %v894_v54, %v4032_v11  ;;  %v4185_v22 = vld [vmem:[%s4697_s0 + $0x5a] sm:$0xff]  ;;  %v4211_v32 = vld [vmem:[%s4698_s1 + $0x10] sm:$0xf]  ;;  %v4257_v48 = vld [vmem:[%s4698_s1 + $0x14] sm:$0xf] }
   0xe   :  { %v618_v47 = vcombine.high %v616_v41, %v616_v41  ;;  %v653_v52 = vsel %vm84_vm0, %v616_v41, 0  ;;  %v626_v1 = vrot.slane %v595_v42, %v4032_v11  ;;  %v925_v2 = vrot.slane %v911_v0, %v4032_v11  ;;  %v4229_v39 = vld [vmem:[%s4697_s0 + $0x6c] sm:$0xff]  ;;  %v4301_v0 = vld [vmem:[%s4698_s1 + $0x18] sm:$0xf] }
   0xf   :  { %3459 = vmatmul.mubr.msk.bf16.vlgmr.msra.gmra.mrb[0].mxu0 %vm80_vm1, %v3456_v25  ;;  %3461 = vmatmul.mubr.msk.bf16.vlgmr.msra.gmra.mrb[0].mxu1 %vm80_vm1, %v3456_v25  ;;  %v635_v53 = vcombine.high %v633_v49, %v633_v49  ;;  %v665_v61 = vsel %vm84_vm0, %v633_v49, 0  ;;  %v617_v62 = vcombine.high %v609_v56, %v609_v56  ;;  %v910_v63 = vcombine.high %v908_v57, %v908_v57 }
  0x10   :  { %195 = vmatpush1.bf16.msra.mxu0 %v98_v26  ;;  %236 = vmatpush1.bf16.msra.mxu1 %v104_v27  ;;  %v647_v5 = vsel %vm84_vm0, %v609_v56, 0  ;;  %v945_v7 = vsel %vm84_vm0, %v908_v57, 0  ;;  %v634_v8 = vcombine.high %v626_v1, %v626_v1  ;;  %v927_v9 = vcombine.high %v925_v2, %v925_v2  ;;  %v4278_v56 = vld [vmem:[%s4697_s0 + $0x7e] sm:$0xff] }
  0x11   :  { %226 = vmatprep.mubr.bf16.mxu0 %v3972_v4  ;;  %267 = vmatprep.mubr.bf16.mxu1 %v3972_v4  ;;  %v1186_v10 = vcombine.high %v4140_v3, %v4140_v3  ;;  %v659_v15 = vsel %vm84_vm0, %v626_v1, 0  ;;  %v957_v16 = vsel %vm84_vm0, %v925_v2, 0  ;;  %v1203_v18 = vcombine.high %v4157_v13, %v4157_v13 }
  0x12   :  { %3629 = vmatprep.subr.bf16.mxu0 %v3973_v30  ;;  %3470 = vmatprep.subr.msk.bf16.mxu1 %vm84_vm0, %v335_v28  ;;  %v901_v20 = vrot.slane %v4096_v50, %v4032_v11  ;;  %v671_v23 = vsel %vm84_vm0, %v3478_v19, 0  ;;  %v1478_v27 = vcombine.high %v4185_v22, %v4185_v22  ;;  %v918_v28 = vrot.slane %v4116_v58, %v4032_v11  ;;  %v4345_v19 = vld [vmem:[%s4697_s0 + $0x98] sm:$0xff] }
  0x13   :  { %v1200_v12 = vrot.slane %v1186_v10, %v4032_v11  ;;  %v1217_v21 = vrot.slane %v1203_v18, %v4032_v11  ;;  %v1210_v54 = vrot.slane %v4157_v13, %v4032_v11  ;;  %v4324_v10 = vld [vmem:[%s4697_s0 + $0x90] sm:$0xff] }
  0x14   :  { %v1492_v29 = vrot.slane %v1478_v27, %v4032_v11  ;;  %v939_v33 = vsel %vm84_vm0, %v901_v20, 0  ;;  %v951_v40 = vsel %vm84_vm0, %v918_v28, 0 }
  0x15   :  { %v1202_v17 = vcombine.high %v1200_v12, %v1200_v12  ;;  %v1237_v24 = vsel %vm84_vm0, %v1200_v12, 0  ;;  %v1219_v26 = vcombine.high %v1217_v21, %v1217_v21  ;;  %v1249_v34 = vsel %vm84_vm0, %v1217_v21, 0 }
  0x16   :  { %v1529_v41 = vsel %vm84_vm0, %v1492_v29, 0  ;;  %v1243_v1 = vsel %vm84_vm0, %v1210_v54, 0 }
  0x17   :  { %3463 = vmatmul.mubr.msk.bf16.vlgmr.msra.gmra.mrb[4].mxu0 %vm80_vm1, %v3456_v25  ;;  %3465 = vmatmul.mubr.msk.bf16.vlgmr.msra.gmra.mrb[4].mxu1 %vm80_vm1, %v3456_v25 }
  0x18   :  { %3630 = vmatpush3.bf16.msra.mxu0 %v110_v35  ;;  %432 = vmatpush1.bf16.msra.mxu1 %v370_v36  ;;  %v926_v35 = vcombine.high %v918_v28, %v918_v28  ;;  %v1494_v36 = vcombine.high %v1492_v29, %v1492_v29 }
  0x19   :  { %3631 = vmatprep.mubr.msk.bf16.mxu0 %vm3974_vm2, %v3973_v30  ;;  %463 = vmatprep.mubr.bf16.mxu1 %v3972_v4 }
  0x1a   :  { %3468 = vmatprep.subr.msk.bf16.mxu0 %vm84_vm0, %v334_v37  ;;  %3474 = vmatprep.subr.msk.bf16.mxu1 %vm84_vm0, %v352_v38  ;;  %v1495_v37 = vcombine.high %v4206_v31, %v4206_v31 }
  0x1c   :  { %v1509_v38 = vrot.slane %v1495_v37, %v4032_v11 }
  0x1e   :  { %v1511_v42 = vcombine.high %v1509_v38, %v1509_v38  ;;  %v1541_v50 = vsel %vm84_vm0, %v1509_v38, 0 }
  0x1f   :  { %3632 = vmatmul.mubr.msk.bf16.vlgmr.msra.gmra.mrb[8].mxu0 %vm80_vm1, %v3456_v25  ;;  %3471 = vmatmul.mubr.msk.bf16.vlgmr.msra.gmra.mrb[0].mxu1 %vm80_vm1, %v30_v43  ;;  %v909_v25 = vcombine.high %v901_v20, %v901_v20  ;;  %v4350_v20 = vld [vmem:[%s4698_s1 + $0x1c] sm:$0xf] }
  0x20   :  { %391 = vmatpush1.bf16.msra.mxu0 %v364_v44  ;;  %514 = vmatpush1.bf16.msra.mxu1 %v382_v45  ;;  %v3489_v44 = vld.sshfl [vmem:[%s4697_s0 + $0x46] sm:$0x3 pattern:$0x76325410]  ;;  %v1193_v45 = vrot.slane %v4140_v3, %v4032_v11 }
  0x21   :  { %422 = vmatprep.mubr.bf16.mxu0 %v3972_v4  ;;  %545 = vmatprep.mubr.bf16.mxu1 %v3972_v4  ;;  %v963_v49 = vsel %vm84_vm0, %v3489_v44, 0 }
  0x22   :  { %3472 = vmatprep.subr.msk.bf16.mxu0 %vm84_vm0, %v351_v46  ;;  %3481 = vmatprep.subr.msk.bf16.mxu1 %vm84_vm0, %v618_v47  ;;  %v4252_v47 = vld [vmem:[%s4697_s0 + $0x74] sm:$0xff]  ;;  %v1231_v57 = vsel %vm84_vm0, %v1193_v45, 0 }
  0x23   :  { %v1794_v37 = vrot.slane %v4252_v47, %v4032_v11 }
  0x27   :  { %3469 = vmatmul.mubr.msk.bf16.vlgmr.msra.gmra.mrb[0].mxu0 %vm80_vm1, %v30_v43  ;;  %3475 = vmatmul.mubr.msk.bf16.vlgmr.msra.gmra.mrb[4].mxu1 %vm80_vm1, %v30_v43 }
  0x28   :  { %473 = vmatpush1.bf16.msra.mxu0 %v376_v51  ;;  %715 = vmatpush1.bf16.msra.mxu1 %v653_v52  ;;  %v1201_v51 = vcombine.high %v1193_v45, %v1193_v45 }
  0x29   :  { %504 = vmatprep.mubr.bf16.mxu0 %v3972_v4  ;;  %746 = vmatprep.mubr.bf16.mxu1 %v3972_v4 }
  0x2a   :  { %3635 = vmatprep.subr.bf16.mxu0 %v3973_v30  ;;  %3485 = vmatprep.subr.msk.bf16.mxu1 %vm84_vm0, %v635_v53  ;;  %v1787_v53 = vcombine.high %v4252_v47, %v4252_v47 }
  0x2c   :  { %v1801_v55 = vrot.slane %v1787_v53, %v4032_v11  ;;  %v2378_v53 = vrot.slane %v4345_v19, %v4032_v11 }
  0x2e   :  { %v1833_v2 = vsel %vm84_vm0, %v1801_v55, 0 }
  0x2f   :  { %3473 = vmatmul.mubr.msk.bf16.vlgmr.msra.gmra.mrb[4].mxu0 %vm80_vm1, %v30_v43  ;;  %3482 = vmatmul.mubr.msk.bf16.vlgmr.msra.gmra.mrb[0].mxu1 %vm80_vm1, %v4121_v59 }
  0x30   :  { %3636 = vmatpush3.bf16.msra.mxu0 %v388_v60  ;;  %797 = vmatpush1.bf16.msra.mxu1 %v665_v61  ;;  %v1803_v60 = vcombine.high %v1801_v55, %v1801_v55  ;;  %v2062_v61 = vcombine.high %v4278_v56, %v4278_v56  ;;  %v2386_v55 = vcombine.high %v2378_v53, %v2378_v53 }
  0x31   :  { %3637 = vmatprep.mubr.msk.bf16.mxu0 %vm3974_vm2, %v3973_v30  ;;  %828 = vmatprep.mubr.bf16.mxu1 %v3972_v4 }
  0x32   :  { %3479 = vmatprep.subr.msk.bf16.mxu0 %vm84_vm0, %v617_v62  ;;  %3492 = vmatprep.subr.msk.bf16.mxu1 %vm84_vm0, %v910_v63  ;;  %v2076_v62 = vrot.slane %v2062_v61, %v4032_v11  ;;  %v4296_v63 = vld [vmem:[%s4697_s0 + $0x86] sm:$0xff] }
  0x33   :  { %v2086_v45 = vrot.slane %v4296_v63, %v4032_v11 }
  0x34   :  { %v2078_v3 = vcombine.high %v2076_v62, %v2076_v62  ;;  %v2113_v13 = vsel %vm84_vm0, %v2076_v62, 0 }
  0x35   :  { %v2094_v47 = vcombine.high %v2086_v45, %v2086_v45 }
  0x37   :  { %3638 = vmatmul.mubr.msk.bf16.vlgmr.msra.gmra.mrb[8].mxu0 %vm80_vm1, %v30_v43  ;;  %3486 = vmatmul.mubr.msk.bf16.vlgmr.msra.gmra.mrb[4].mxu1 %vm80_vm1, %v4121_v59  ;;  %v1770_v43 = vcombine.high %v4229_v39, %v4229_v39 }
  0x38   :  { %674 = vmatpush1.bf16.msra.mxu0 %v647_v5  ;;  %1007 = vmatpush1.bf16.msra.mxu1 %v945_v7  ;;  %v2079_v5 = vcombine.high %v4296_v63, %v4296_v63  ;;  %v3500_v7 = vld.sshfl [vmem:[%s4697_s0 + $0x58] sm:$0x3 pattern:$0x76325410] }
  0x39   :  { %705 = vmatprep.mubr.bf16.mxu0 %v3972_v4  ;;  %1038 = vmatprep.mubr.bf16.mxu1 %v3972_v4  ;;  %v1784_v46 = vrot.slane %v1770_v43, %v4032_v11  ;;  %v1255_v12 = vsel %vm84_vm0, %v3500_v7, 0 }
  0x3a   :  { %3483 = vmatprep.subr.msk.bf16.mxu0 %vm84_vm0, %v634_v8  ;;  %3496 = vmatprep.subr.msk.bf16.mxu1 %vm84_vm0, %v927_v9  ;;  %v1485_v8 = vrot.slane %v4185_v22, %v4032_v11  ;;  %v2093_v9 = vrot.slane %v2079_v5, %v4032_v11  ;;  %v2657_v5 = vsub.s32 2, %v4025_v6 }
  0x3b   :  { %v1786_v52 = vcombine.high %v1784_v46, %v1784_v46  ;;  %v1821_v58 = vsel %vm84_vm0, %v1784_v46, 0 }
  0x3c   :  { %v1523_v21 = vsel %vm84_vm0, %v1485_v8, 0  ;;  %v2125_v22 = vsel %vm84_vm0, %v2093_v9, 0 }
  0x3f   :  { %3480 = vmatmul.mubr.msk.bf16.vlgmr.msra.gmra.mrb[0].mxu0 %vm80_vm1, %v4121_v59  ;;  %3493 = vmatmul.mubr.msk.bf16.vlgmr.msra.gmra.mrb[0].mxu1 %vm80_vm1, %v4162_v14 }
  0x40   :  { %756 = vmatpush1.bf16.msra.mxu0 %v659_v15  ;;  %1089 = vmatpush1.bf16.msra.mxu1 %v957_v16  ;;  %v2095_v15 = vcombine.high %v2093_v9, %v2093_v9  ;;  %v2354_v16 = vcombine.high %v4324_v10, %v4324_v10 }
  0x41   :  { %787 = vmatprep.mubr.bf16.mxu0 %v3972_v4  ;;  %1120 = vmatprep.mubr.bf16.mxu1 %v3972_v4 }
  0x42   :  { %3641 = vmatprep.subr.bf16.mxu0 %v3973_v30  ;;  %3503 = vmatprep.subr.msk.bf16.mxu1 %vm84_vm0, %v1202_v17  ;;  %v1502_v17 = vrot.slane %v4206_v31, %v4032_v11  ;;  %v2368_v18 = vrot.slane %v2354_v16, %v4032_v11  ;;  %v3511_v31 = vld.sshfl [vmem:[%s4697_s0 + $0x6a] sm:$0x3 pattern:$0x76325410] }
  0x44   :  { %v1535_v27 = vsel %vm84_vm0, %v1502_v17, 0  ;;  %v2405_v28 = vsel %vm84_vm0, %v2368_v18, 0 }
  0x47   :  { %3484 = vmatmul.mubr.msk.bf16.vlgmr.msra.gmra.mrb[4].mxu0 %vm80_vm1, %v4121_v59  ;;  %3497 = vmatmul.mubr.msk.bf16.vlgmr.msra.gmra.mrb[4].mxu1 %vm80_vm1, %v4162_v14 }
  0x48   :  { %3642 = vmatpush3.bf16.msra.mxu0 %v671_v23  ;;  %1299 = vmatpush1.bf16.msra.mxu1 %v1237_v24  ;;  %v1510_v23 = vcombine.high %v1502_v17, %v1502_v17  ;;  %v2370_v24 = vcombine.high %v2368_v18, %v2368_v18 }
  0x49   :  { %3643 = vmatprep.mubr.msk.bf16.mxu0 %vm3974_vm2, %v3973_v30  ;;  %1330 = vmatprep.mubr.bf16.mxu1 %v3972_v4 }
  0x4a   :  { %3490 = vmatprep.subr.msk.bf16.mxu0 %vm84_vm0, %v909_v25  ;;  %3507 = vmatprep.subr.msk.bf16.mxu1 %vm84_vm0, %v1219_v26  ;;  %v2371_v25 = vcombine.high %v4345_v19, %v4345_v19  ;;  %v2669_v19 = vsub.s32 5, %v4025_v6 }
  0x4c   :  { %v2385_v26 = vrot.slane %v2371_v25, %v4032_v11 }
  0x4e   :  { %v2387_v29 = vcombine.high %v2385_v26, %v2385_v26 }
  0x4f   :  { %3644 = vmatmul.mubr.msk.bf16.vlgmr.msra.gmra.mrb[8].mxu0 %vm80_vm1, %v4121_v59  ;;  %3504 = vmatmul.mubr.msk.bf16.vlgmr.msra.gmra.mrb[0].mxu1 %vm80_vm1, %v4211_v32  ;;  %v1218_v59 = vcombine.high %v1210_v54, %v1210_v54 }
  0x50   :  { %966 = vmatpush1.bf16.msra.mxu0 %v939_v33  ;;  %1381 = vmatpush1.bf16.msra.mxu1 %v1249_v34  ;;  %v4383_v33 = vld [vmem:[%s4698_s1 + $0x20] sm:$0xf]  ;;  %v1547_v34 = vsel %vm84_vm0, %v3511_v31, 0 }
  0x51   :  { %997 = vmatprep.mubr.bf16.mxu0 %v3972_v4  ;;  %1412 = vmatprep.mubr.bf16.mxu1 %v3972_v4 }
  0x52   :  { %3494 = vmatprep.subr.msk.bf16.mxu0 %vm84_vm0, %v926_v35  ;;  %3514 = vmatprep.subr.msk.bf16.mxu1 %vm84_vm0, %v1494_v36  ;;  %v2417_v35 = vsel %vm84_vm0, %v2385_v26, 0 }
  0x57   :  { %3491 = vmatmul.mubr.msk.bf16.vlgmr.msra.gmra.mrb[0].mxu0 %vm80_vm1, %v4162_v14  ;;  %3508 = vmatmul.mubr.msk.bf16.vlgmr.msra.gmra.mrb[4].mxu1 %vm80_vm1, %v4211_v32 }
  0x58   :  { %1048 = vmatpush1.bf16.msra.mxu0 %v951_v40  ;;  %1591 = vmatpush1.bf16.msra.mxu1 %v1529_v41  ;;  %v1827_v40 = vsel %vm84_vm0, %v1794_v37, 0  ;;  %v2069_v41 = vrot.slane %v4278_v56, %v4032_v11  ;;  %v2411_v56 = vsel %vm84_vm0, %v2378_v53, 0 }
  0x59   :  { %1079 = vmatprep.mubr.bf16.mxu0 %v3972_v4  ;;  %1622 = vmatprep.mubr.bf16.mxu1 %v3972_v4 }
  0x5a   :  { %3647 = vmatprep.subr.bf16.mxu0 %v3973_v30  ;;  %3518 = vmatprep.subr.msk.bf16.mxu1 %vm84_vm0, %v1511_v42  ;;  %v3522_v42 = vld.sshfl [vmem:[%s4697_s0 + $0x7c] sm:$0x3 pattern:$0x76325410]  ;;  %v2077_v44 = vcombine.high %v2069_v41, %v2069_v41  ;;  %v2107_v46 = vsel %vm84_vm0, %v2069_v41, 0 }
  0x5b   :  { %v1839_v43 = vsel %vm84_vm0, %v3522_v42, 0 }
  0x5f   :  { %3495 = vmatmul.mubr.msk.bf16.vlgmr.msra.gmra.mrb[4].mxu0 %vm80_vm1, %v4162_v14  ;;  %3515 = vmatmul.mubr.msk.bf16.vlgmr.msra.gmra.mrb[0].mxu1 %vm80_vm1, %v4257_v48 }
  0x60   :  { %3648 = vmatpush3.bf16.msra.mxu0 %v963_v49  ;;  %1673 = vmatpush1.bf16.msra.mxu1 %v1541_v50  ;;  %v2361_v49 = vrot.slane %v4324_v10, %v4032_v11  ;;  %v3533_v50 = vld.sshfl [vmem:[%s4697_s0 + $0x8e] sm:$0x3 pattern:$0x76325410] }
  0x61   :  { %3649 = vmatprep.mubr.msk.bf16.mxu0 %vm3974_vm2, %v3973_v30  ;;  %1704 = vmatprep.mubr.bf16.mxu1 %v3972_v4 }
  0x62   :  { %3501 = vmatprep.subr.msk.bf16.mxu0 %vm84_vm0, %v1201_v51  ;;  %3525 = vmatprep.subr.msk.bf16.mxu1 %vm84_vm0, %v1786_v52  ;;  %v2131_v51 = vsel %vm84_vm0, %v3533_v50, 0  ;;  %v2369_v52 = vcombine.high %v2361_v49, %v2361_v49  ;;  %v2399_v54 = vsel %vm84_vm0, %v2361_v49, 0 }
  0x67   :  { %3650 = vmatmul.mubr.msk.bf16.vlgmr.msra.gmra.mrb[8].mxu0 %vm80_vm1, %v4162_v14  ;;  %3519 = vmatmul.mubr.msk.bf16.vlgmr.msra.gmra.mrb[4].mxu1 %vm80_vm1, %v4257_v48  ;;  %v1493_v14 = vcombine.high %v1485_v8, %v1485_v8  ;;  %v2661_v8 = vsub.s32 3, %v4025_v6 }
  0x68   :  { %1258 = vmatpush1.bf16.msra.mxu0 %v1231_v57  ;;  %1883 = vmatpush1.bf16.msra.mxu1 %v1821_v58 }
  0x69   :  { %1289 = vmatprep.mubr.bf16.mxu0 %v3972_v4  ;;  %1914 = vmatprep.mubr.bf16.mxu1 %v3972_v4 }
  0x6a   :  { %3505 = vmatprep.subr.msk.bf16.mxu0 %vm84_vm0, %v1218_v59  ;;  %3529 = vmatprep.subr.msk.bf16.mxu1 %vm84_vm0, %v1803_v60 }
  0x6f   :  { %3502 = vmatmul.mubr.msk.bf16.vlgmr.msra.gmra.mrb[0].mxu0 %vm80_vm1, %v4211_v32  ;;  %3526 = vmatmul.mubr.msk.bf16.vlgmr.msra.gmra.mrb[0].mxu1 %vm80_vm1, %v4301_v0 }
  0x70   :  { %1340 = vmatpush1.bf16.msra.mxu0 %v1243_v1  ;;  %1965 = vmatpush1.bf16.msra.mxu1 %v1833_v2  ;;  %v4477_v1 = vsub.s32 0, %v4025_v6  ;;  %v2653_v2 = vsub.s32 1, %v4025_v6 }
  0x71   :  { %1371 = vmatprep.mubr.bf16.mxu0 %v3972_v4  ;;  %1996 = vmatprep.mubr.bf16.mxu1 %v3972_v4 }
  0x72   :  { %3653 = vmatprep.subr.bf16.mxu0 %v3973_v30  ;;  %3536 = vmatprep.subr.msk.bf16.mxu1 %vm84_vm0, %v2078_v3  ;;  %v3555_v3 = vld [vmem:[%s4699_s3 + $0x1] ss:$2 sm:$0xff] }
  0x73   :  { %v2650_v7 = vrot.slane %v3555_v3, %v4477_v1  ;;  %v2654_v9 = vrot.slane %v3555_v3, %v2653_v2  ;;  %v2658_v10 = vrot.slane %v3555_v3, %v2657_v5  ;;  %v2662_v16 = vrot.slane %v3555_v3, %v2661_v8 }
  0x77   :  { %3506 = vmatmul.mubr.msk.bf16.vlgmr.msra.gmra.mrb[4].mxu0 %vm80_vm1, %v4211_v32  ;;  %3530 = vmatmul.mubr.msk.bf16.vlgmr.msra.gmra.mrb[4].mxu1 %vm80_vm1, %v4301_v0 }
  0x78   :  { %3654 = vmatpush3.bf16.msra.mxu0 %v1255_v12  ;;  %2175 = vmatpush1.bf16.msra.mxu1 %v2113_v13 }
  0x79   :  { %3655 = vmatprep.mubr.msk.bf16.mxu0 %vm3974_vm2, %v3973_v30  ;;  %2206 = vmatprep.mubr.bf16.mxu1 %v3972_v4 }
  0x7a   :  { %3512 = vmatprep.subr.msk.bf16.mxu0 %vm84_vm0, %v1493_v14  ;;  %3540 = vmatprep.subr.msk.bf16.mxu1 %vm84_vm0, %v2095_v15  ;;  %v2665_v15 = vsub.s32 4, %v4025_v6 }
  0x7f   :  { %3656 = vmatmul.mubr.msk.bf16.vlgmr.msra.gmra.mrb[8].mxu0 %vm80_vm1, %v4211_v32  ;;  %3537 = vmatmul.mubr.msk.bf16.vlgmr.msra.gmra.mrb[0].mxu1 %vm80_vm1, %v4350_v20  ;;  %v1777_v32 = vrot.slane %v4229_v39, %v4032_v11  ;;  %v1802_v39 = vcombine.high %v1794_v37, %v1794_v37  ;;  %v3544_v11 = vld.sshfl [vmem:[%s4697_s0 + $0xa0] sm:$0x3 pattern:$0x76325410] }
  0x80   :  { %1550 = vmatpush1.bf16.msra.mxu0 %v1523_v21  ;;  %2257 = vmatpush1.bf16.msra.mxu1 %v2125_v22  ;;  %v2423_v57 = vsel %vm84_vm0, %v3544_v11, 0  ;;  %v3556_v37 = vld [vmem:[%s4699_s3 + $0x11] ss:$2 sm:$0x1] }
  0x81   :  { %1581 = vmatprep.mubr.bf16.mxu0 %v3972_v4  ;;  %2288 = vmatprep.mubr.bf16.mxu1 %v3972_v4  ;;  %v1785_v36 = vcombine.high %v1777_v32, %v1777_v32  ;;  %v1815_v38 = vsel %vm84_vm0, %v1777_v32, 0 }
  0x82   :  { %3516 = vmatprep.subr.msk.bf16.mxu0 %vm84_vm0, %v1510_v23  ;;  %3547 = vmatprep.subr.msk.bf16.mxu1 %vm84_vm0, %v2370_v24  ;;  %v2673_v23 = vsub.s32 6, %v4025_v6  ;;  %v2666_v24 = vrot.slane %v3555_v3, %v2665_v15 }
  0x84   :  { %v2674_v32 = vrot.slane %v3555_v3, %v2673_v23 }
  0x87   :  { %3513 = vmatmul.mubr.msk.bf16.vlgmr.msra.gmra.mrb[0].mxu0 %vm80_vm1, %v4257_v48  ;;  %3541 = vmatmul.mubr.msk.bf16.vlgmr.msra.gmra.mrb[4].mxu1 %vm80_vm1, %v4350_v20 }
  0x88   :  { %1632 = vmatpush1.bf16.msra.mxu0 %v1535_v27  ;;  %2467 = vmatpush1.bf16.msra.mxu1 %v2405_v28  ;;  %v2670_v27 = vrot.slane %v3555_v3, %v2669_v19  ;;  %v2677_v28 = vsub.s32 7, %v4025_v6  ;;  %v3961_v6 = vld [vmem:[%s4701_s4 + $0x28] sm:$0xff]  }
  0x89   :  { %1663 = vmatprep.mubr.bf16.mxu0 %v3972_v4  ;;  %2498 = vmatprep.mubr.bf16.mxu1 %v3972_v4 }
  0x8a   :  { %3659 = vmatprep.subr.bf16.mxu0 %v3973_v30  ;;  %3551 = vmatprep.subr.msk.bf16.mxu1 %vm84_vm0, %v2387_v29 }
  0x8f   :  { %3517 = vmatmul.mubr.msk.bf16.vlgmr.msra.gmra.mrb[4].mxu0 %vm80_vm1, %v4257_v48  ;;  %3548 = vmatmul.mubr.msk.bf16.vlgmr.msra.gmra.mrb[0].mxu1 %vm80_vm1, %v4383_v33 }
  0x90   :  { %3660 = vmatpush3.bf16.msra.mxu0 %v1547_v34  ;;  %2549 = vmatpush1.bf16.msra.mxu1 %v2417_v35 }
  0x91   :  { %3661 = vmatprep.mubr.msk.bf16.mxu0 %vm3974_vm2, %v3973_v30  ;;  %2580 = vmatprep.mubr.bf16.mxu1 %v3972_v4 }
  0x92   :  { %3523 = vmatprep.subr.msk.bf16.mxu0 %vm84_vm0, %v1785_v36  ;;  %3683 = vmatprep.subr.bf16.mxu1 %v3973_v30 }
  0x97   :  { %3662 = vmatmul.mubr.msk.bf16.vlgmr.msra.gmra.mrb[8].mxu0 %vm80_vm1, %v4257_v48  ;;  %3552 = vmatmul.mubr.msk.bf16.vlgmr.msra.gmra.mrb[4].mxu1 %vm80_vm1, %v4383_v33  ;;  %v2119_v48 = vsel %vm84_vm0, %v2086_v45, 0 }
  0x98   :  { %1842 = vmatpush1.bf16.msra.mxu0 %v1815_v38  ;;  %1873 = vmatprep.mubr.bf16.mxu0 %v3972_v4  ;;  %v2678_v38 = vrot.slane %v3555_v3, %v2677_v28 }
  0x99   :  { %3527 = vmatprep.subr.msk.bf16.mxu0 %vm84_vm0, %v1802_v39  ;;  %3685 = vmatprep.mubr.msk.bf16.mxu1 %vm3974_vm2, %v3973_v30 }
  0x9f   :  { %3524 = vmatmul.mubr.msk.bf16.vlgmr.msra.gmra.mrb[0].mxu0 %vm80_vm1, %v4301_v0 }
  0xa0   :  { %1924 = vmatpush1.bf16.msra.mxu0 %v1827_v40  ;;  %1955 = vmatprep.mubr.bf16.mxu0 %v3972_v4 }
  0xa1   :  { %3665 = vmatprep.subr.bf16.mxu0 %v3973_v30 }
  0xa7   :  { %3528 = vmatmul.mubr.msk.bf16.vlgmr.msra.gmra.mrb[4].mxu0 %vm80_vm1, %v4301_v0 }
  0xa8   :  { %3666 = vmatpush3.bf16.msra.mxu0 %v1839_v43  ;;  %3667 = vmatprep.mubr.msk.bf16.mxu0 %vm3974_vm2, %v3973_v30  ;;  %v2682_v43 = vrot.slane %v3556_v37, %v4477_v1 }
  0xa9   :  { %3534 = vmatprep.subr.msk.bf16.mxu0 %vm84_vm0, %v2077_v44 }
  0xaf   :  { %3668 = vmatmul.mubr.msk.bf16.vlgmr.msra.gmra.mrb[8].mxu0 %vm80_vm1, %v4301_v0 }
  0xb0   :  { %2134 = vmatpush1.bf16.msra.mxu0 %v2107_v46  ;;  %2165 = vmatprep.mubr.bf16.mxu0 %v3972_v4 }
  0xb1   :  { %3538 = vmatprep.subr.msk.bf16.mxu0 %vm84_vm0, %v2094_v47 }
  0xb7   :  { %3535 = vmatmul.mubr.msk.bf16.vlgmr.msra.gmra.mrb[0].mxu0 %vm80_vm1, %v4350_v20 }
  0xb8   :  { %2216 = vmatpush1.bf16.msra.mxu0 %v2119_v48  ;;  %2247 = vmatprep.mubr.bf16.mxu0 %v3972_v4 }
  0xb9   :  { %3671 = vmatprep.subr.bf16.mxu0 %v3973_v30 }
  0xbf   :  { %3539 = vmatmul.mubr.msk.bf16.vlgmr.msra.gmra.mrb[4].mxu0 %vm80_vm1, %v4350_v20 }
  0xc0   :  { %3672 = vmatpush3.bf16.msra.mxu0 %v2131_v51  ;;  %3673 = vmatprep.mubr.msk.bf16.mxu0 %vm3974_vm2, %v3973_v30 }
  0xc1   :  { %3545 = vmatprep.subr.msk.bf16.mxu0 %vm84_vm0, %v2369_v52 }
  0xc7   :  { %3674 = vmatmul.mubr.msk.bf16.vlgmr.msra.gmra.mrb[8].mxu0 %vm80_vm1, %v4350_v20 }
  0xc8   :  { %2426 = vmatpush1.bf16.msra.mxu0 %v2399_v54  ;;  %2457 = vmatprep.mubr.bf16.mxu0 %v3972_v4 }
  0xc9   :  { %3549 = vmatprep.subr.msk.bf16.mxu0 %vm84_vm0, %v2386_v55 }
  0xcf   :  { %3546 = vmatmul.mubr.msk.bf16.vlgmr.msra.gmra.mrb[0].mxu0 %vm80_vm1, %v4383_v33 }
  0xd0   :  { %2508 = vmatpush1.bf16.msra.mxu0 %v2411_v56  ;;  %2539 = vmatprep.mubr.bf16.mxu0 %v3972_v4 }
  0xd1   :  { %3677 = vmatprep.subr.bf16.mxu0 %v3973_v30 }
  0xd7   :  { %3550 = vmatmul.mubr.msk.bf16.vlgmr.msra.gmra.mrb[4].mxu0 %vm80_vm1, %v4383_v33 }
  0xd8   :  { %3678 = vmatpush3.bf16.msra.mxu0 %v2423_v57  ;;  %3679 = vmatprep.mubr.msk.bf16.mxu0 %vm3974_vm2, %v3973_v30 }
  0xdf   :  { %3680 = vmatmul.mubr.msk.bf16.vlgmr.msra.gmra.mrb[8].mxu0 %vm80_vm1, %v4383_v33 }
 0x162   :  { %v4468_v58 = vpop.f32.mrb[0].mxu1 }
 0x163   :  { %v4470_v4 = vpop.f32.mrb[1].mxu1  ;;  %v2694_v21 = vmul.f32 %v2658_v10, %v4468_v58 }
 0x164   :  { %v2504_v59 = vpop.f32.mrb[2].mxu1  ;;  %v2695_v25 = vmul.f32 %v2662_v16, %v4470_v4 }
 0x165   :  { %v2505_v60 = vpop.f32.mrb[3].mxu1 }
 0x16a   :  { %v4472_v61 = vpop.f32.mrb[4].mxu1 }
 0x16b   :  { %v4474_v62 = vpop.f32.mrb[5].mxu1  ;;  %v2698_v41 = vmul.f32 %v2674_v32, %v4472_v61 }
 0x16c   :  { %v2586_v63 = vpop.f32.mrb[6].mxu1  ;;  %v2699_v44 = vmul.f32 %v2678_v38, %v4474_v62 }
 0x16d   :  { %v2587_v0 = vpop.f32.mrb[7].mxu1 }
 0x1a2   :  { %v4490_v12 = vpop.f32.mrb[0].mxu0 }
 0x1a3   :  { %v2692_v13 = vmul.f32 %v2650_v7, %v4490_v12  ;;  %v4493_v14 = vpop.f32.mrb[1].mxu0 }
 0x1a4   :  { %v2693_v17 = vmul.f32 %v2654_v9, %v4493_v14  ;;  %v2463_v18 = vpop.f32.mrb[2].mxu0 }
 0x1a5   :  { %v2464_v20 = vpop.f32.mrb[3].mxu0 }
 0x1a6   :  { %v2701_v22 = vadd.f32 %v2693_v17, %v2692_v13 }
 0x1a8   :  { %v2702_v26 = vadd.f32 %v2701_v22, %v2694_v21 }
 0x1aa   :  { %v4508_v29 = vpop.f32.mrb[4].mxu0  ;;  %v2703_v31 = vadd.f32 %v2702_v26, %v2695_v25 }
 0x1ab   :  { %v2696_v33 = vmul.f32 %v2666_v24, %v4508_v29  ;;  %v4513_v34 = vpop.f32.mrb[5].mxu0 }
 0x1ac   :  { %v2697_v35 = vmul.f32 %v2670_v27, %v4513_v34  ;;  %v2545_v36 = vpop.f32.mrb[6].mxu0 }
 0x1ad   :  { %v2704_v39 = vadd.f32 %v2703_v31, %v2696_v33  ;;  %v2546_v40 = vpop.f32.mrb[7].mxu0 }
 0x1af   :  { %v2705_v42 = vadd.f32 %v2704_v39, %v2697_v35 }
 0x1b1   :  { %v2706_v45 = vadd.f32 %v2705_v42, %v2698_v41 }
 0x1b2   :  { %v4524_v46 = vpop.f32.mrb[8].mxu0 }
 0x1b3   :  { %v3681_v47 = vpop.f32.mrb[9].mxu0  ;;  %v2700_v48 = vmul.f32 %v2682_v43, %v4524_v46  ;;  %v2707_v49 = vadd.f32 %v2706_v45, %v2699_v44 }
 0x1b4   :  { %v2626_v50 = vpop.f32.mrb[10].mxu0 }
 0x1b5   :  { %v3682_v51 = vpop.f32.mrb[11].mxu0  ;;  %v2708_v52 = vadd.f32 %v2707_v49, %v2700_v48 }
 0x1b7   :  { %2709 = vadd.xlane.f32.xlu0 %v2708_v52 }
 0x244   :  { %v2710_v53 = vpop.xlane.xlu0 %2709 }
 0x245   :  { %v2711_v54 = vmul.f32 0.001953125, %v2710_v53  ;;  %v3975_v53 = vmov 1  }
 0x246   :  { %3936 = vset.pattern.permute.xlu0 %v3975_v53 }
 0x247   :  { %v2712_v55 = vsub.f32 %v4490_v12, %v2711_v54  ;;  %v2713_v56 = vsub.f32 %v4493_v14, %v2711_v54  ;;  %v2714_v11 = vsub.f32 %v4468_v58, %v2711_v54  ;;  %v2715_v57 = vsub.f32 %v4470_v4, %v2711_v54 }
 0x248   :  { %v2716_v59 = vsub.f32 %v4508_v29, %v2711_v54  ;;  %v2717_v3 = vsub.f32 %v4513_v34, %v2711_v54  ;;  %v2718_v20 = vsub.f32 %v4472_v61, %v2711_v54  ;;  %v2719_v26 = vsub.f32 %v4474_v62, %v2711_v54 }
 0x249   :  { %v2721_v60 = vmul.f32 %v2712_v55, %v2712_v55  ;;  %v2722_v63 = vmul.f32 %v2713_v56, %v2713_v56  ;;  %v2723_v0 = vmul.f32 %v2714_v11, %v2714_v11  ;;  %v2724_v13 = vmul.f32 %v2715_v57, %v2715_v57  ;;  %v4546_v11 = vld [vmem:[%s4699_s3] ss:$2 sm:$0xff] }
 0x24a   :  { %v2725_v21 = vmul.f32 %v2716_v59, %v2716_v59  ;;  %v2726_v31 = vmul.f32 %v2717_v3, %v2717_v3  ;;  %v2720_v36 = vsub.f32 %v4524_v46, %v2711_v54  ;;  %v2727_v37 = vmul.f32 %v2718_v20, %v2718_v20 }
 0x24b   :  { %v2730_v17 = vmul.f32 %v2721_v60, %v2650_v7  ;;  %v2731_v18 = vmul.f32 %v2722_v63, %v2654_v9  ;;  %v2732_v22 = vmul.f32 %v2723_v0, %v2658_v10  ;;  %v2733_v33 = vmul.f32 %v2724_v13, %v2662_v16 }
 0x24c   :  { %v2734_v39 = vmul.f32 %v2725_v21, %v2666_v24  ;;  %v2728_v41 = vmul.f32 %v2719_v26, %v2719_v26  ;;  %v2735_v42 = vmul.f32 %v2726_v31, %v2670_v27  ;;  %v2729_v7 = vmul.f32 %v2720_v36, %v2720_v36  ;;  %v2750_v24 = vld [vmem:[%s4700_s2] sm:$0xff] }
 0x24d   :  { %v2739_v25 = vadd.f32 %v2731_v18, %v2730_v17  ;;  %v2736_v9 = vmul.f32 %v2727_v37, %v2674_v32  ;;  %v2806_v3 = vrot.slane %v4546_v11, %v2653_v2  ;;  %v3554_v37 = vld [vmem:[%s4699_s3 + $0x10] ss:$2 sm:$0x1] }
 0x24e   :  { %v2737_v47 = vmul.f32 %v2728_v41, %v2678_v38  ;;  %v2738_v10 = vmul.f32 %v2729_v7, %v2682_v43 }
 0x24f   :  { %v2740_v35 = vadd.f32 %v2739_v25, %v2732_v22 }
 0x251   :  { %v2741_v40 = vadd.f32 %v2740_v35, %v2733_v33 }
 0x253   :  { %v2742_v44 = vadd.f32 %v2741_v40, %v2734_v39  ;;  %v3956_v39 = vld [vmem:[%s4701_s4 + $0x8] sm:$0xff]  }
 0x255   :  { %v2743_v45 = vadd.f32 %v2742_v44, %v2735_v42 }
 0x257   :  { %v2744_v48 = vadd.f32 %v2743_v45, %v2736_v9  ;;  %v2834_v9 = vrot.slane %v3554_v37, %v4477_v1 }
 0x259   :  { %v2745_v49 = vadd.f32 %v2744_v48, %v2737_v47 }
 0x25b   :  { %v2746_v50 = vadd.f32 %v2745_v49, %v2738_v10 }
 0x25d   :  { %2747 = vadd.xlane.f32.xlu0 %v2746_v50 }
 0x2ea   :  { %v2748_v51 = vpop.xlane.xlu0 %2747 }
 0x2eb   :  { %v2749_v16 = vmul.f32 0.001953125, %v2748_v51 }
 0x2ed   :  { %v2751_v52 = vadd.f32 1e-05, %v2749_v16  ;;  %v3957_v16 = vld [vmem:[%s4701_s4] sm:$0xff]  }
 0x2ef   :  { %3965 = vrsqrt.f32 %v2751_v52 }
 0x2f9   :  { %v3966_v27 = vpop.eup %3965 }
 0x2fa   :  { %v2753_v32 = vmul.f32 %v3966_v27, %v2750_v24 }
 0x2fc   :  { %v2754_v55 = vmul.f32 %v2753_v32, %v2711_v54 }
 0x2fe   :  { %2756 = vrot.lane.b32.xlu1 %v2754_v55, %s3976_s8 }
 0x302   :  { %2762 = vperm.xlu1 %3935, %v2753_v32   ;;  %v2814_v32 = vrot.slane %v4546_v11, %v2661_v8 }
 0x370   :  { %v2757_v38 = vpop.permute.xlu1 %2756 }
 0x371   :  { %v2759_v43 = vsub.f32 %v2750_v24, %v2757_v38  ;;  %v3958_v38 = vld [vmem:[%s4701_s4 + $0x10] sm:$0xff]  }
 0x373   :  { %2776 = vperm.xlu0 %3936, %v2759_v43  }
 0x381   :  { %v4541_v56 = vpop.permute.xlu1 %2762 }
 0x382   :  { %v2766_v57 = vmul.f32 %v4541_v56, %v4493_v14  ;;  %v2765_v54 = vmul.f32 %v4541_v56, %v4490_v12  ;;  %v2771_v60 = vmul.f32 %v4541_v56, %v4472_v61  ;;  %v2772_v63 = vmul.f32 %v4541_v56, %v4474_v62 }
 0x383   :  { %v2802_v14 = vrot.slane %v4546_v11, %v4477_v1  ;;  %v2826_v61 = vrot.slane %v4546_v11, %v2673_v23  ;;  %v2830_v62 = vrot.slane %v4546_v11, %v2677_v28  ;;  %v2767_v35 = vmul.f32 %v4541_v56, %v4468_v58 }
 0x384   :  { %v2773_v42 = vmul.f32 %v4541_v56, %v4524_v46  ;;  %v2810_v46 = vrot.slane %v4546_v11, %v2657_v5  ;;  %v2768_v1 = vmul.f32 %v4541_v56, %v4470_v4  ;;  %v2769_v55 = vmul.f32 %v4541_v56, %v4508_v29 }
 0x3f2   :  { %v4552_v59 = vpop.permute.xlu0 %2776 }
 0x3f3   :  { %v2780_v0 = vadd.f32 %v4552_v59, %v2766_v57  ;;  %v2779_v13 = vadd.f32 %v4552_v59, %v2765_v54  ;;  %v2785_v12 = vadd.f32 %v4552_v59, %v2771_v60  ;;  %v2786_v17 = vadd.f32 %v4552_v59, %v2772_v63 }
 0x3f4   :  { %v2781_v41 = vadd.f32 %v4552_v59, %v2767_v35  ;;  %v2787_v7 = vadd.f32 %v4552_v59, %v2773_v42  ;;  %v2782_v52 = vadd.f32 %v4552_v59, %v2768_v1  ;;  %v2783_v57 = vadd.f32 %v4552_v59, %v2769_v55  ;;  %v3592_v55 = vld [vmem:[%s4702_s6] ss:$0 sm:$0xff] }
 0x3f5   :  { %v2789_v18 = vmax.f32 %v2780_v0, 0.0  ;;  %v2788_v20 = vmax.f32 %v2779_v13, 0.0  ;;  %v2794_v2 = vmax.f32 %v2785_v12, 0.0  ;;  %v2795_v21 = vmax.f32 %v2786_v17, 0.0  ;;  %v3959_v0 = vld [vmem:[%s4701_s4 + $0x18] sm:$0xff]   ;;  %v3964_v17 = vld [vmem:[%s4701_s4 + $0x40] sm:$0xff]  }
 0x3f6   :  { %v2790_v47 = vmax.f32 %v2781_v41, 0.0  ;;  %v2796_v48 = vmax.f32 %v2787_v7, 0.0  ;;  %v2791_v27 = vmax.f32 %v2782_v52, 0.0  ;;  %v2792_v54 = vmax.f32 %v2783_v57, 0.0 }
 0x3f7   :  { %v2845_v22 = vmul.f32 %v2806_v3, %v2789_v18  ;;  %v2844_v25 = vmul.f32 %v2802_v14, %v2788_v20  ;;  %v2850_v26 = vmul.f32 %v2826_v61, %v2794_v2  ;;  %v2851_v31 = vmul.f32 %v2830_v62, %v2795_v21  ;;  %v3591_v62 = vld [vmem:[%s4702_s6 + $0x1] ss:$0 sm:$0xff] }
 0x3f8   :  { %v2852_v10 = vmul.f32 %v2834_v9, %v2796_v48  ;;  %v2846_v49 = vmul.f32 %v2810_v46, %v2790_v47  ;;  %v2847_v4 = vmul.f32 %v2814_v32, %v2791_v27  ;;  %v2818_v60 = vrot.slane %v4546_v11, %v2665_v15  ;;  %v3398_v9 = vld [vmem:[%s4703_s5] sm:$0xff]  ;;  %v3399_v46 = vld [vmem:[%s4703_s5 + $0x8] sm:$0xff] }
 0x3f9   :  { %v2854_v33 = vpack.c.bf16 %v2845_v22, %v2845_v22  ;;  %v2859_v23 = vpack.c.bf16 %v2850_v26, %v2850_v26  ;;  %v2860_v36 = vpack.c.bf16 %v2851_v31, %v2851_v31  ;;  %v2853_v40 = vpack.c.bf16 %v2844_v25, %v2844_v25 }
 0x3fa   :  { %v2861_v50 = vpack.c.bf16 %v2852_v10, %v2852_v10  ;;  %v2855_v5 = vpack.c.bf16 %v2846_v49, %v2846_v49  ;;  %v2856_v43 = vpack.c.bf16 %v2847_v4, %v2847_v4  ;;  %v2848_v29 = vmul.f32 %v2818_v60, %v2792_v54 }
 0x3fb   :  { %v2878_v28 = vsel %vm2876_vm3, %v2854_v33, 0  ;;  %v3213_v58 = vsel %vm2876_vm3, %v2859_v23, 0  ;;  %v4587_v44 = vsel %vm2876_vm3, %v2860_v36, 0  ;;  %v2930_v45 = vsel %vm2876_vm3, %v2853_v40, 0 }
 0x3fc   :  { %3684 = vmatpush3.bf16.msra.mxu1 %v2878_v28  ;;  %v3327_v51 = vsel %vm2876_vm3, %v2861_v50, 0  ;;  %v2985_v24 = vsel %vm2876_vm3, %v2855_v5, 0  ;;  %v3042_v8 = vsel %vm2876_vm3, %v2856_v43, 0  ;;  %v2770_v63 = vmul.f32 %v4541_v56, %v4513_v34  ;;  %v3960_v56 = vld [vmem:[%s4701_s4 + $0x20] sm:$0xff]  }
 0x3fd   :  { %3689 = vmatprep.subr.bf16.mxu1 %v3973_v30  ;;  %v2857_v3 = vpack.c.bf16 %v2848_v29, %v2848_v29  ;;  %v2822_v12 = vrot.slane %v4546_v11, %v2669_v19  ;;  %v3962_v19 = vld [vmem:[%s4701_s4 + $0x30] sm:$0xff]   ;;  %v3963_v11 = vld [vmem:[%s4701_s4 + $0x38] sm:$0xff]  }
 0x3fe   :  { %v2784_v13 = vadd.f32 %v4552_v59, %v2770_v63 }
 0x3ff   :  { %3686 = vmatmul.mubr.msk.bf16.vlgmr.msra.gmra.mrb[8].mxu1 %vm2872_vm4, %v3956_v39  ;;  %v3099_v15 = vsel %vm2876_vm3, %v2857_v3, 0 }
 0x400   :  { %3690 = vmatpush3.bf16.msra.mxu1 %v2930_v45  ;;  %3691 = vmatprep.mubr.msk.bf16.mxu1 %vm3974_vm2, %v3973_v30  ;;  %v2793_v14 = vmax.f32 %v2784_v13, 0.0 }
 0x401   :  { %3695 = vmatprep.subr.bf16.mxu1 %v3973_v30 }
 0x402   :  { %v2849_v34 = vmul.f32 %v2822_v12, %v2793_v14 }
 0x404   :  { %v2858_v59 = vpack.c.bf16 %v2849_v34, %v2849_v34 }
 0x406   :  { %v3156_v61 = vsel %vm2876_vm3, %v2858_v59, 0 }
 0x40b   :  { %3692 = vmatmul.mubr.msk.bf16.vlgmr.msra.gmra.mrb[8].mxu1 %vm2872_vm4, %v3957_v16 }
 0x40c   :  { %3696 = vmatpush3.bf16.msra.mxu1 %v2985_v24  ;;  %3697 = vmatprep.mubr.msk.bf16.mxu1 %vm3974_vm2, %v3973_v30 }
 0x40d   :  { %3701 = vmatprep.subr.bf16.mxu1 %v3973_v30 }
 0x417   :  { %3698 = vmatmul.mubr.msk.bf16.vlgmr.msra.gmra.mrb[8].mxu1 %vm2872_vm4, %v3958_v38 }
 0x418   :  { %3702 = vmatpush3.bf16.msra.mxu1 %v3042_v8  ;;  %3703 = vmatprep.mubr.msk.bf16.mxu1 %vm3974_vm2, %v3973_v30 }
 0x419   :  { %3707 = vmatprep.subr.bf16.mxu1 %v3973_v30 }
 0x423   :  { %3704 = vmatmul.mubr.msk.bf16.vlgmr.msra.gmra.mrb[8].mxu1 %vm2872_vm4, %v3959_v0 }
 0x424   :  { %3708 = vmatpush3.bf16.msra.mxu1 %v3099_v15  ;;  %3709 = vmatprep.mubr.msk.bf16.mxu1 %vm3974_vm2, %v3973_v30 }
 0x425   :  { %3713 = vmatprep.subr.bf16.mxu1 %v3973_v30 }
 0x42f   :  { %3710 = vmatmul.mubr.msk.bf16.vlgmr.msra.gmra.mrb[8].mxu1 %vm2872_vm4, %v3960_v56 }
 0x430   :  { %3714 = vmatpush3.bf16.msra.mxu1 %v3156_v61  ;;  %3715 = vmatprep.mubr.msk.bf16.mxu1 %vm3974_vm2, %v3973_v30 }
 0x431   :  { %3719 = vmatprep.subr.bf16.mxu1 %v3973_v30 }
 0x43b   :  { %3716 = vmatmul.mubr.msk.bf16.vlgmr.msra.gmra.mrb[8].mxu1 %vm2872_vm4, %v3961_v6 }
 0x43c   :  { %3720 = vmatpush3.bf16.msra.mxu1 %v3213_v58  ;;  %3721 = vmatprep.mubr.msk.bf16.mxu1 %vm3974_vm2, %v3973_v30 }
 0x43d   :  { %3725 = vmatprep.subr.bf16.mxu1 %v3973_v30 }
 0x447   :  { %3722 = vmatmul.mubr.msk.bf16.vlgmr.msra.gmra.mrb[8].mxu1 %vm2872_vm4, %v3962_v19 }
 0x448   :  { %3726 = vmatpush3.bf16.msra.mxu1 %v4587_v44  ;;  %3727 = vmatprep.mubr.msk.bf16.mxu1 %vm3974_vm2, %v3973_v30 }
 0x449   :  { %3731 = vmatprep.subr.bf16.mxu1 %v3973_v30 }
 0x453   :  { %3728 = vmatmul.mubr.msk.bf16.vlgmr.msra.gmra.mrb[8].mxu1 %vm2872_vm4, %v3963_v11 }
 0x454   :  { %3732 = vmatpush3.bf16.msra.mxu1 %v3327_v51  ;;  %3733 = vmatprep.mubr.msk.bf16.mxu1 %vm3974_vm2, %v3973_v30 }
 0x45f   :  { %3734 = vmatmul.mubr.msk.bf16.vlgmr.msra.gmra.mrb[8].mxu1 %vm2872_vm4, %v3964_v17 }
 0x532   :  { %v3363_v18 = vpop.f32.mrb[8].mxu1 }
 0x533   :  { %v3735_v20 = vpop.f32.mrb[9].mxu1  ;;  %v3378_v2 = vmul.f32 %v3591_v62, %v3363_v18 }
 0x534   :  { %v3366_v21 = vpop.f32.mrb[10].mxu1 }
 0x535   :  { %3380 = vadd.xlane.f32.xlu1 %v3378_v2  ;;  %v3736_v22 = vpop.f32.mrb[11].mxu1  ;;  %v3379_v25 = vmul.f32 %v3591_v62, %v3366_v21 }
 0x539   :  { %3382 = vadd.xlane.f32.xlu1 %v3379_v25 }
 0x5c2   :  { %v3381_v26 = vpop.xlane.xlu1 %3380 }
 0x5c3   :  { %v3384_v30 = vmul.f32 0.0078125, %v3381_v26 }
 0x5c5   :  { %v3386_v31 = vsub.f32 %v3363_v18, %v3384_v30 }
 0x5c6   :  { %v3383_v33 = vpop.xlane.xlu1 %3382 }
 0x5c7   :  { %v3388_v35 = vmul.f32 %v3386_v31, %v3386_v31  ;;  %v3385_v23 = vmul.f32 0.0078125, %v3383_v33 }
 0x5c9   :  { %v3387_v36 = vsub.f32 %v3366_v21, %v3385_v23  ;;  %v3390_v37 = vmul.f32 %v3591_v62, %v3388_v35 }
 0x5cb   :  { %v3389_v28 = vmul.f32 %v3387_v36, %v3387_v36  ;;  %3392 = vadd.xlane.f32.xlu1 %v3390_v37 }
 0x5cd   :  { %v3391_v39 = vmul.f32 %v3591_v62, %v3389_v28 }
 0x5cf   :  { %3394 = vadd.xlane.f32.xlu0 %v3391_v39 }
 0x658   :  { %v3393_v40 = vpop.xlane.xlu1 %3392 }
 0x659   :  { %v3396_v41 = vmul.f32 0.0078125, %v3393_v40 }
 0x65b   :  { %v3400_v42 = vadd.f32 1e-05, %v3396_v41 }
 0x65c   :  { %v3395_v58 = vpop.xlane.xlu0 %3394 }
 0x65d   :  { %3967 = vrsqrt.f32 %v3400_v42  ;;  %v3397_v44 = vmul.f32 0.0078125, %v3395_v58 }
 0x65f   :  { %v3401_v7 = vadd.f32 1e-05, %v3397_v44 }
 0x661   :  { %3969 = vrsqrt.f32 %v3401_v7 }
 0x667   :  { %v3968_v45 = vpop.eup %3967 }
 0x668   :  { %v3404_v47 = vmul.f32 %v3968_v45, %v3398_v9 }
 0x66a   :  { %v3406_v48 = vmul.f32 %v3404_v47, %v3384_v30 }
 0x66b   :  { %v3970_v10 = vpop.eup %3969 }
 0x66c   :  { %3410 = vrot.lane.b32.xlu1 %v3406_v48, %s3976_s8  ;;  %v3405_v49 = vmul.f32 %v3970_v10, %v3399_v46 }
 0x66e   :  { %v3407_v50 = vmul.f32 %v3405_v49, %v3385_v23 }
 0x670   :  { %3412 = vrot.lane.b32.xlu1 %v3407_v50, %s3976_s8 }
 0x674   :  { %3420 = vperm.xlu1 %3935, %v3404_v47  }
 0x678   :  { %3425 = vperm.xlu1 %3935, %v3405_v49  }
 0x67c   :  { %3937 = vset.pattern.permute.xlu1 %v3975_v53 }
 0x6de   :  { %v3411_v1 = vpop.permute.xlu1 %3410 }
 0x6df   :  { %v3416_v51 = vsub.f32 %v3398_v9, %v3411_v1 }
 0x6e1   :  { %3432 = vperm.xlu1 %3937, %v3416_v51  }
 0x6e2   :  { %v3413_v16 = vpop.permute.xlu1 %3412 }
 0x6e3   :  { %v3417_v5 = vsub.f32 %v3399_v46, %v3413_v16 }
 0x6e5   :  { %3437 = vperm.xlu0 %3936, %v3417_v5  }
 0x6f3   :  { %v3421_v52 = vpop.permute.xlu1 %3420 }
 0x6f4   :  { %v3428_v27 = vmul.f32 %v3421_v52, %v3363_v18 }
 0x6f7   :  { %v3426_v24 = vpop.permute.xlu1 %3425 }
 0x6f8   :  { %v3429_v38 = vmul.f32 %v3426_v24, %v3366_v21 }
 0x760   :  { %v3433_v32 = vpop.permute.xlu1 %3432 }
 0x761   :  { %v3440_v4 = vadd.f32 %v3433_v32, %v3428_v27 }
 0x763   :  { %v3442_v43 = vmax.f32 %v3440_v4, 0.0 }
 0x764   :  { %v3438_v57 = vpop.permute.xlu0 %3437 }
 0x765   :  { %v3448_v8 = vmul.f32 %v3592_v55, %v3442_v43  ;;  %v3441_v53 = vadd.f32 %v3438_v57, %v3429_v38 }
 0x767   :  { %3450 = vst [vmem:[%s4704_s7] sm:$0xff] %v3448_v8  ;;  %v3443_v54 = vmax.f32 %v3441_v53, 0.0 }
 0x769   :  { %v3449_v60 = vmul.f32 %v3592_v55, %v3443_v54 }
 0x76b   :  { %3451 = vst [vmem:[%s4704_s7 + $0x8] sm:$0xff] %v3449_v60 }

</bundles_post_ra>
